<compile_context>
chip_gen: v5e
topology: v5e:2x2
jax: 0.10.0
libtpu: 0.0.40
codegen_flags: <defaults>
</compile_context>

<pallas_src>
import functools
import math

import jax
import jax.numpy as jnp
from jax.experimental import pallas as pl
from jax.experimental.pallas import tpu as pltpu


# ----------------------------- config ---------------------------------------
VOCAB     = 64
MAX_POS   = 32
HIDDEN    = 64
N_HEADS   = 4
HEAD_DIM  = HIDDEN // N_HEADS
INTERMED  = 128
N_LAYERS  = 2
N_LABELS  = 3            # xnli: contradiction / neutral / entailment
LN_EPS    = 1e-5
PAD_IDX   = 1            # roberta padding_idx
LOGIT_PAD = 128          # lane-dense classifier output width (sliced to 3)

_F32  = jnp.float32
_BF16 = jnp.bfloat16


# ----------------------------- in-kernel helpers -----------------------------
def _layernorm(x, g, b):
    """Row-wise LayerNorm over last dim; x:[N,H] f32, g/b:[1,H] f32."""
    mu = jnp.mean(x, axis=-1, keepdims=True)
    xc = x - mu
    var = jnp.mean(xc * xc, axis=-1, keepdims=True)
    return xc * jax.lax.rsqrt(var + LN_EPS) * g + b


def _erf(x):
    # Abramowitz & Stegun 7.1.26 (|err| < 1.5e-7).  Keeps HF's exact-GELU
    # semantics without relying on an erf lowering inside Mosaic.
    a1, a2, a3, a4, a5 = (0.254829592, -0.284496736, 1.421413741,
                          -1.453152027, 1.061405429)
    p = 0.3275911
    s = jnp.where(x >= 0.0, 1.0, -1.0)
    ax = jnp.abs(x)
    t = 1.0 / (1.0 + p * ax)
    poly = t * (a1 + t * (a2 + t * (a3 + t * (a4 + t * a5))))
    return s * (1.0 - poly * jnp.exp(-ax * ax))


def _gelu_exact(x):
    return 0.5 * x * (1.0 + _erf(x * (1.0 / math.sqrt(2.0))))


def _mm(x, w, b=None):
    """bf16 MXU operands, f32 accumulation; optional f32 bias add."""
    y = jnp.dot(x.astype(_BF16), w.astype(_BF16),
                preferred_element_type=_F32)
    if b is not None:
        y = y + b
    return y


# ----------------------------- fused forward kernel --------------------------
def _fused_forward_kernel(
    ids_ref, pos_ref, mask_ref,
    wemb_ref, pemb_ref, temb_ref, embg_ref, embb_ref,
    wqkv_ref, bqkv_ref, wo_ref, bo_ref, ln1g_ref, ln1b_ref,
    wi_ref, bi_ref, wo2_ref, bo2_ref, ln2g_ref, ln2b_ref,
    clsw_ref, clsb_ref, outw_ref, outb_ref,
    o_ref,
    *, batch, seq):
    bs = batch * seq
    scale = 1.0 / math.sqrt(HEAD_DIM)

    # ---- embeddings: one-hot MXU "gathers", stay resident in VMEM ----
    ids = ids_ref[...]                                   # [BS,1] int32
    pos = pos_ref[...]                                   # [BS,1] int32
    iota_v = jax.lax.broadcasted_iota(jnp.int32, (bs, VOCAB), 1)
    iota_p = jax.lax.broadcasted_iota(jnp.int32, (bs, MAX_POS), 1)
    onehot_w = jnp.where(iota_v == ids, 1.0, 0.0)        # [BS,VOCAB] f32
    onehot_p = jnp.where(iota_p == pos, 1.0, 0.0)        # [BS,MAX_POS] f32
    h = (_mm(onehot_w, wemb_ref[...])
         + _mm(onehot_p, pemb_ref[...])
         + temb_ref[...])                                # [BS,H] f32
    h = _layernorm(h, embg_ref[...], embb_ref[...])

    # additive attention bias over the key axis (HF extended_attention_mask;
    # -1e9 stand-in for dtype-min, fine in f32 scores)
    neg_bias = (1.0 - mask_ref[...]) * (-1e9)            # [B,S] f32

    # ---- transformer encoder layers (stacked weights, fori_loop) ----
    def layer_body(l, h):
        qkv = _mm(h, wqkv_ref[l], bqkv_ref[l])           # [BS,3H] (fused QKV)

        ctx_rows = []
        for b in range(batch):
            r0, r1 = b * seq, (b + 1) * seq
            bias_b = neg_bias[b:b + 1, :]                # [1,S]
            head_ctx = []
            for hh in range(N_HEADS):
                c0 = hh * HEAD_DIM
                q_bh = qkv[r0:r1, c0:c0 + HEAD_DIM]                      # [S,Dh]
                k_bh = qkv[r0:r1, HIDDEN + c0:HIDDEN + c0 + HEAD_DIM]
                v_bh = qkv[r0:r1, 2 * HIDDEN + c0:2 * HIDDEN + c0 + HEAD_DIM]
                s = jax.lax.dot_general(
                    q_bh.astype(_BF16), k_bh.astype(_BF16),
                    dimension_numbers=(((1,), (1,)), ((), ())),
                    preferred_element_type=_F32) * scale                 # [S,S]
                s = s + bias_b
                m = jnp.max(s, axis=-1, keepdims=True)
                p = jnp.exp(s - m)
                denom = jnp.sum(p, axis=-1, keepdims=True)
                p = p * pl.reciprocal(denom, approx=True)
                head_ctx.append(
                    jnp.dot(p.astype(_BF16), v_bh.astype(_BF16),
                            preferred_element_type=_F32))                # [S,Dh]
            ctx_rows.append(jnp.concatenate(head_ctx, axis=1))           # [S,H]
        ctx = jnp.concatenate(ctx_rows, axis=0)                          # [BS,H]

        attn_out = _mm(ctx, wo_ref[l], bo_ref[l])
        h = _layernorm(attn_out + h, ln1g_ref[l], ln1b_ref[l])           # fused residual+LN

        inter = _gelu_exact(_mm(h, wi_ref[l], bi_ref[l]))                # [BS,I]
        ffn_out = _mm(inter, wo2_ref[l], bo2_ref[l])
        h = _layernorm(ffn_out + h, ln2g_ref[l], ln2b_ref[l])
        return h

    h = jax.lax.fori_loop(0, N_LAYERS, layer_body, h)

    # ---- RobertaClassificationHead (first-token pooling, no dropout @ eval) --
    pooled = jnp.concatenate([h[b * seq:b * seq + 1, :] for b in range(batch)],
                             axis=0)                                     # [B,H]
    pooled = jnp.tanh(_mm(pooled, clsw_ref[...], clsb_ref[...]))
    logits = _mm(pooled, outw_ref[...], outb_ref[...])                   # [B,128]
    o_ref[...] = logits.astype(o_ref.dtype)


# ----------------------------- parameters ------------------------------------
def _init_params(key):
    def nrm(k, shape, scale=0.02):
        return scale * jax.random.normal(k, shape, dtype=_F32)

    keys = iter(jax.random.split(key, 64))
    params = {
        "word_emb": nrm(next(keys), (VOCAB, HIDDEN)),
        "pos_emb":  nrm(next(keys), (MAX_POS, HIDDEN)),
        "type_emb": nrm(next(keys), (1, HIDDEN)),
        "emb_ln_g": jnp.ones((1, HIDDEN), _F32),
        "emb_ln_b": jnp.zeros((1, HIDDEN), _F32),
        "cls_dense_w": nrm(next(keys), (HIDDEN, HIDDEN)),
        "cls_dense_b": jnp.zeros((1, HIDDEN), _F32),
        "cls_out_w": nrm(next(keys), (HIDDEN, N_LABELS)),
        "cls_out_b": jnp.zeros((1, N_LABELS), _F32),
    }
    wqkv, wo, wi, wo2 = [], [], [], []
    for _ in range(N_LAYERS):
        wq = nrm(next(keys), (HIDDEN, HIDDEN))
        wk = nrm(next(keys), (HIDDEN, HIDDEN))
        wv = nrm(next(keys), (HIDDEN, HIDDEN))
        wqkv.append(jnp.concatenate([wq, wk, wv], axis=1))   # fused QKV [H,3H]
        wo.append(nrm(next(keys), (HIDDEN, HIDDEN)))
        wi.append(nrm(next(keys), (HIDDEN, INTERMED)))
        wo2.append(nrm(next(keys), (INTERMED, HIDDEN)))
    params.update({
        "wqkv": jnp.stack(wqkv),                                  # [L,H,3H]
        "bqkv": jnp.zeros((N_LAYERS, 1, 3 * HIDDEN), _F32),
        "wo":   jnp.stack(wo),                                    # [L,H,H]
        "bo":   jnp.zeros((N_LAYERS, 1, HIDDEN), _F32),
        "ln1_g": jnp.ones((N_LAYERS, 1, HIDDEN), _F32),
        "ln1_b": jnp.zeros((N_LAYERS, 1, HIDDEN), _F32),
        "wi":   jnp.stack(wi),                                    # [L,H,I]
        "bi":   jnp.zeros((N_LAYERS, 1, INTERMED), _F32),
        "wo2":  jnp.stack(wo2),                                   # [L,I,H]
        "bo2":  jnp.zeros((N_LAYERS, 1, HIDDEN), _F32),
        "ln2_g": jnp.ones((N_LAYERS, 1, HIDDEN), _F32),
        "ln2_b": jnp.zeros((N_LAYERS, 1, HIDDEN), _F32),
    })
    return params


# ----------------------------- wrapper ---------------------------------------
def _create_position_ids(input_ids):
    # transformers.roberta create_position_ids_from_input_ids:
    # pad tokens keep padding_idx; real tokens get cumsum offsets.
    mask = (input_ids != PAD_IDX).astype(jnp.int32)
    return jnp.cumsum(mask, axis=1) * mask + PAD_IDX


def _cost_estimate(B, S, inputs):
    bs = B * S
    mm = lambda m, k, n: 2 * m * k * n
    flops = mm(bs, VOCAB, HIDDEN) + mm(bs, MAX_POS, HIDDEN)
    per_layer = (mm(bs, HIDDEN, 3 * HIDDEN)
                 + B * N_HEADS * (mm(S, HEAD_DIM, S) + mm(S, S, HEAD_DIM))
                 + mm(bs, HIDDEN, HIDDEN)
                 + mm(bs, HIDDEN, INTERMED) + mm(bs, INTERMED, HIDDEN))
    flops += N_LAYERS * per_layer
    flops += mm(B, HIDDEN, HIDDEN) + mm(B, HIDDEN, LOGIT_PAD)
    transcendentals = N_LAYERS * (B * N_HEADS * S * S + bs * INTERMED) + B * HIDDEN
    bytes_accessed = (sum(int(x.size) * x.dtype.itemsize for x in inputs)
                      + B * LOGIT_PAD * 4)
    return int(flops), int(transcendentals), int(bytes_accessed)


def xlm_roberta_classify(params, input_ids, attention_mask=None):
    """Equivalent of PyTorch_to_TorchScript.forward(data, attention_mask):
    returns classification logits [B, N_LABELS]."""
    B, S = input_ids.shape
    if attention_mask is None:
        attention_mask = jnp.ones((B, S), _F32)
    attention_mask = attention_mask.astype(_F32)

    position_ids = _create_position_ids(input_ids)
    ids_col = input_ids.reshape(B * S, 1).astype(jnp.int32)
    pos_col = position_ids.reshape(B * S, 1).astype(jnp.int32)

    bf = lambda x: x.astype(_BF16)   # MXU weight matrices in bf16 (f32 accum)

    # lane-dense classifier output: pad out_proj to 128 lanes, slice after.
    outw_pad = jnp.zeros((HIDDEN, LOGIT_PAD), _F32).at[:, :N_LABELS].set(
        params["cls_out_w"])
    outb_pad = jnp.zeros((1, LOGIT_PAD), _F32).at[:, :N_LABELS].set(
        params["cls_out_b"])

    inputs = (
        ids_col, pos_col, attention_mask,
        bf(params["word_emb"]), bf(params["pos_emb"]), params["type_emb"],
        params["emb_ln_g"], params["emb_ln_b"],
        bf(params["wqkv"]), params["bqkv"], bf(params["wo"]), params["bo"],
        params["ln1_g"], params["ln1_b"],
        bf(params["wi"]), params["bi"], bf(params["wo2"]), params["bo2"],
        params["ln2_g"], params["ln2_b"],
        bf(params["cls_dense_w"]), params["cls_dense_b"],
        bf(outw_pad), outb_pad,
    )

    flops, transc, bytes_acc = _cost_estimate(B, S, inputs)

    logits_pad = pl.pallas_call(
        functools.partial(_fused_forward_kernel, batch=B, seq=S),
        out_shape=jax.ShapeDtypeStruct((B, LOGIT_PAD), _F32),
        in_specs=[pl.BlockSpec(memory_space=pltpu.MemorySpace.VMEM)] * len(inputs),
        out_specs=pl.BlockSpec(memory_space=pltpu.MemorySpace.VMEM),
        cost_estimate=pl.CostEstimate(
            flops=flops, transcendentals=transc, bytes_accessed=bytes_acc),
        compiler_params=pltpu.CompilerParams(vmem_limit_bytes=64 * 1024 * 1024),
    )(*inputs)

    return logits_pad[:, :N_LABELS]                       # [B,3]


# ----------------------------- main ------------------------------------------
if __name__ == "__main__":
    key = jax.random.PRNGKey(0)
    pkey, dkey = jax.random.split(key)

    params = _init_params(pkey)

    B, S = 2, 8
    input_ids = jax.random.randint(dkey, (B, S), 0, VOCAB, dtype=jnp.int32)
    attention_mask = jnp.ones((B, S), _F32).at[1, 6:].set(0.0)

    fwd = jax.jit(xlm_roberta_classify)
    logits = jax.block_until_ready(fwd(params, input_ids, attention_mask))

    assert logits.shape == (B, N_LABELS)
    assert jnp.all(jnp.isfinite(logits))
    print("KERNEL_OK")
</pallas_src>

<mosaic_0001>
module attributes {stable_mosaic.version = 11 : i64} {
  func.func @_fused_forward_kernel(%arg0: memref<16x1xi32, #tpu.memory_space<vmem>>, %arg1: memref<16x1xi32, #tpu.memory_space<vmem>>, %arg2: memref<2x8xf32, #tpu.memory_space<vmem>>, %arg3: memref<64x64xbf16, #tpu.memory_space<vmem>>, %arg4: memref<32x64xbf16, #tpu.memory_space<vmem>>, %arg5: memref<1x64xf32, #tpu.memory_space<vmem>>, %arg6: memref<1x64xf32, #tpu.memory_space<vmem>>, %arg7: memref<1x64xf32, #tpu.memory_space<vmem>>, %arg8: memref<2x64x192xbf16, #tpu.memory_space<vmem>>, %arg9: memref<2x1x192xf32, #tpu.memory_space<vmem>>, %arg10: memref<2x64x64xbf16, #tpu.memory_space<vmem>>, %arg11: memref<2x1x64xf32, #tpu.memory_space<vmem>>, %arg12: memref<2x1x64xf32, #tpu.memory_space<vmem>>, %arg13: memref<2x1x64xf32, #tpu.memory_space<vmem>>, %arg14: memref<2x64x128xbf16, #tpu.memory_space<vmem>>, %arg15: memref<2x1x128xf32, #tpu.memory_space<vmem>>, %arg16: memref<2x128x64xbf16, #tpu.memory_space<vmem>>, %arg17: memref<2x1x64xf32, #tpu.memory_space<vmem>>, %arg18: memref<2x1x64xf32, #tpu.memory_space<vmem>>, %arg19: memref<2x1x64xf32, #tpu.memory_space<vmem>>, %arg20: memref<64x64xbf16, #tpu.memory_space<vmem>>, %arg21: memref<1x64xf32, #tpu.memory_space<vmem>>, %arg22: memref<64x128xbf16, #tpu.memory_space<vmem>>, %arg23: memref<1x128xf32, #tpu.memory_space<vmem>>, %arg24: memref<2x128xf32, #tpu.memory_space<vmem>>) attributes {dimension_semantics = [], scalar_prefetch = 0 : i64, scratch_operands = 0 : i64, tpu.core_type = #tpu.core_type<tc>} {
    %c0 = arith.constant 0 : index
    %c0_0 = arith.constant 0 : index
    %0 = vector.load %arg0[%c0, %c0_0] : memref<16x1xi32, #tpu.memory_space<vmem>>, vector<16x1xi32>
    %c0_1 = arith.constant 0 : index
    %c0_2 = arith.constant 0 : index
    %1 = vector.load %arg1[%c0_1, %c0_2] : memref<16x1xi32, #tpu.memory_space<vmem>>, vector<16x1xi32>
    %2 = tpu.iota {dimensions = array<i32: 1>} : vector<16x64xi32>
    %3 = tpu.iota {dimensions = array<i32: 1>} : vector<16x32xi32>
    %4 = vector.broadcast %0 : vector<16x1xi32> to vector<16x64xi32>
    %5 = arith.cmpi eq, %2, %4 : vector<16x64xi32>
    %cst = arith.constant 1.000000e+00 : f32
    %cst_3 = arith.constant 0.000000e+00 : f32
    %6 = vector.broadcast %cst : f32 to vector<16x64xf32>
    %7 = vector.broadcast %cst_3 : f32 to vector<16x64xf32>
    %8 = arith.select %5, %6, %7 : vector<16x64xi1>, vector<16x64xf32>
    %9 = vector.broadcast %1 : vector<16x1xi32> to vector<16x32xi32>
    %10 = arith.cmpi eq, %3, %9 : vector<16x32xi32>
    %cst_4 = arith.constant 1.000000e+00 : f32
    %cst_5 = arith.constant 0.000000e+00 : f32
    %11 = vector.broadcast %cst_4 : f32 to vector<16x32xf32>
    %12 = vector.broadcast %cst_5 : f32 to vector<16x32xf32>
    %13 = arith.select %10, %11, %12 : vector<16x32xi1>, vector<16x32xf32>
    %c0_6 = arith.constant 0 : index
    %c0_7 = arith.constant 0 : index
    %14 = vector.load %arg3[%c0_6, %c0_7] : memref<64x64xbf16, #tpu.memory_space<vmem>>, vector<64x64xbf16>
    %15 = arith.truncf %8 : vector<16x64xf32> to vector<16x64xbf16>
    %cst_8 = arith.constant dense<0.000000e+00> : vector<16x64xf32>
    %16 = tpu.matmul %15, %14, %cst_8 {dimension_numbers = #tpu.dot_dimension_numbers<[1], [0], [0], [1], [0, 0, 1, 1], [], []>} : vector<16x64xbf16>, vector<64x64xbf16>, vector<16x64xf32> -> vector<16x64xf32>
    %c0_9 = arith.constant 0 : index
    %c0_10 = arith.constant 0 : index
    %17 = vector.load %arg4[%c0_9, %c0_10] : memref<32x64xbf16, #tpu.memory_space<vmem>>, vector<32x64xbf16>
    %18 = arith.truncf %13 : vector<16x32xf32> to vector<16x32xbf16>
    %cst_11 = arith.constant dense<0.000000e+00> : vector<16x64xf32>
    %19 = tpu.matmul %18, %17, %cst_11 {dimension_numbers = #tpu.dot_dimension_numbers<[1], [0], [0], [1], [0, 0, 1, 1], [], []>} : vector<16x32xbf16>, vector<32x64xbf16>, vector<16x64xf32> -> vector<16x64xf32>
    %20 = arith.addf %16, %19 : vector<16x64xf32>
    %c0_12 = arith.constant 0 : index
    %c0_13 = arith.constant 0 : index
    %21 = vector.load %arg5[%c0_12, %c0_13] : memref<1x64xf32, #tpu.memory_space<vmem>>, vector<1x64xf32>
    %22 = vector.broadcast %21 : vector<1x64xf32> to vector<16x64xf32>
    %23 = arith.addf %20, %22 : vector<16x64xf32>
    %c0_14 = arith.constant 0 : index
    %c0_15 = arith.constant 0 : index
    %24 = vector.load %arg6[%c0_14, %c0_15] : memref<1x64xf32, #tpu.memory_space<vmem>>, vector<1x64xf32>
    %c0_16 = arith.constant 0 : index
    %c0_17 = arith.constant 0 : index
    %25 = vector.load %arg7[%c0_16, %c0_17] : memref<1x64xf32, #tpu.memory_space<vmem>>, vector<1x64xf32>
    %cst_18 = arith.constant dense<0.000000e+00> : vector<16xf32>
    %26 = vector.multi_reduction <add>, %23, %cst_18 [1] : vector<16x64xf32> to vector<16xf32>
    %27 = vector.shape_cast %26 : vector<16xf32> to vector<16x1xf32>
    %cst_19 = arith.constant 6.400000e+01 : f32
    %28 = vector.broadcast %cst_19 : f32 to vector<16x1xf32>
    %29 = arith.divf %27, %28 : vector<16x1xf32>
    %30 = vector.broadcast %29 : vector<16x1xf32> to vector<16x64xf32>
    %31 = arith.subf %23, %30 : vector<16x64xf32>
    %32 = arith.mulf %31, %31 : vector<16x64xf32>
    %cst_20 = arith.constant dense<0.000000e+00> : vector<16xf32>
    %33 = vector.multi_reduction <add>, %32, %cst_20 [1] : vector<16x64xf32> to vector<16xf32>
    %34 = vector.shape_cast %33 : vector<16xf32> to vector<16x1xf32>
    %cst_21 = arith.constant 6.400000e+01 : f32
    %35 = vector.broadcast %cst_21 : f32 to vector<16x1xf32>
    %36 = arith.divf %34, %35 : vector<16x1xf32>
    %cst_22 = arith.constant 9.99999974E-6 : f32
    %37 = vector.broadcast %cst_22 : f32 to vector<16x1xf32>
    %38 = arith.addf %36, %37 : vector<16x1xf32>
    %39 = math.rsqrt %38 : vector<16x1xf32>
    %40 = vector.broadcast %39 : vector<16x1xf32> to vector<16x64xf32>
    %41 = arith.mulf %31, %40 : vector<16x64xf32>
    %42 = vector.broadcast %24 : vector<1x64xf32> to vector<16x64xf32>
    %43 = arith.mulf %41, %42 : vector<16x64xf32>
    %44 = vector.broadcast %25 : vector<1x64xf32> to vector<16x64xf32>
    %45 = arith.addf %43, %44 : vector<16x64xf32>
    %c0_23 = arith.constant 0 : index
    %c0_24 = arith.constant 0 : index
    %46 = vector.load %arg2[%c0_23, %c0_24] : memref<2x8xf32, #tpu.memory_space<vmem>>, vector<2x8xf32>
    %cst_25 = arith.constant 1.000000e+00 : f32
    %47 = vector.broadcast %cst_25 : f32 to vector<2x8xf32>
    %48 = arith.subf %47, %46 : vector<2x8xf32>
    %cst_26 = arith.constant -1.000000e+09 : f32
    %49 = vector.broadcast %cst_26 : f32 to vector<2x8xf32>
    %50 = arith.mulf %48, %49 : vector<2x8xf32>
    %c0_i32 = arith.constant 0 : i32
    %c2_i32 = arith.constant 2 : i32
    %51 = arith.addi %c0_i32, %c2_i32 : i32
    %c1_i32 = arith.constant 1 : i32
    %52 = scf.for %arg25 = %c0_i32 to %51 step %c1_i32 iter_args(%arg26 = %45) -> (vector<16x64xf32>)  : i32 {
      %70 = arith.index_cast %arg25 : i32 to index
      %c0_40 = arith.constant 0 : index
      %c0_41 = arith.constant 0 : index
      %71 = vector.load %arg8[%70, %c0_40, %c0_41] : memref<2x64x192xbf16, #tpu.memory_space<vmem>>, vector<1x64x192xbf16>
      %72 = vector.shape_cast %71 : vector<1x64x192xbf16> to vector<64x192xbf16>
      %73 = arith.index_cast %arg25 : i32 to index
      %c0_42 = arith.constant 0 : index
      %c0_43 = arith.constant 0 : index
      %74 = vector.load %arg9[%73, %c0_42, %c0_43] : memref<2x1x192xf32, #tpu.memory_space<vmem>>, vector<1x1x192xf32>
      %75 = vector.shape_cast %74 : vector<1x1x192xf32> to vector<1x192xf32>
      %76 = arith.truncf %arg26 : vector<16x64xf32> to vector<16x64xbf16>
      %cst_44 = arith.constant dense<0.000000e+00> : vector<16x192xf32>
      %77 = tpu.matmul %76, %72, %cst_44 {dimension_numbers = #tpu.dot_dimension_numbers<[1], [0], [0], [1], [0, 0, 1, 1], [], []>} : vector<16x64xbf16>, vector<64x192xbf16>, vector<16x192xf32> -> vector<16x192xf32>
      %78 = vector.broadcast %75 : vector<1x192xf32> to vector<16x192xf32>
      %79 = arith.addf %77, %78 : vector<16x192xf32>
      %80 = vector.extract_strided_slice %50 {offsets = [0, 0], sizes = [1, 8], strides = [1, 1]} : vector<2x8xf32> to vector<1x8xf32>
      %81 = vector.extract_strided_slice %79 {offsets = [0, 0], sizes = [8, 16], strides = [1, 1]} : vector<16x192xf32> to vector<8x16xf32>
      %82 = vector.extract_strided_slice %79 {offsets = [0, 64], sizes = [8, 16], strides = [1, 1]} : vector<16x192xf32> to vector<8x16xf32>
      %83 = vector.extract_strided_slice %79 {offsets = [0, 128], sizes = [8, 16], strides = [1, 1]} : vector<16x192xf32> to vector<8x16xf32>
      %84 = arith.truncf %81 : vector<8x16xf32> to vector<8x16xbf16>
      %85 = arith.truncf %82 : vector<8x16xf32> to vector<8x16xbf16>
      %cst_45 = arith.constant dense<0.000000e+00> : vector<8x8xf32>
      %86 = tpu.matmul %84, %85, %cst_45 {dimension_numbers = #tpu.dot_dimension_numbers<[1], [1], [0], [0], [0, 0, 1, 0], [], []>} : vector<8x16xbf16>, vector<8x16xbf16>, vector<8x8xf32> -> vector<8x8xf32>
      %cst_46 = arith.constant 2.500000e-01 : f32
      %87 = vector.broadcast %cst_46 : f32 to vector<8x8xf32>
      %88 = arith.mulf %86, %87 : vector<8x8xf32>
      %89 = vector.broadcast %80 : vector<1x8xf32> to vector<8x8xf32>
      %90 = arith.addf %88, %89 : vector<8x8xf32>
      %cst_47 = arith.constant dense<0xFF800000> : vector<8xf32>
      %91 = vector.multi_reduction <maximumf>, %90, %cst_47 [1] : vector<8x8xf32> to vector<8xf32>
      %92 = vector.shape_cast %91 : vector<8xf32> to vector<8x1xf32>
      %93 = vector.broadcast %92 : vector<8x1xf32> to vector<8x8xf32>
      %94 = arith.subf %90, %93 : vector<8x8xf32>
      %95 = math.exp %94 : vector<8x8xf32>
      %cst_48 = arith.constant dense<0.000000e+00> : vector<8xf32>
      %96 = vector.multi_reduction <add>, %95, %cst_48 [1] : vector<8x8xf32> to vector<8xf32>
      %97 = vector.shape_cast %96 : vector<8xf32> to vector<8x1xf32>
      %98 = tpu.reciprocal %97 {approx = true} : vector<8x1xf32> -> vector<8x1xf32>
      %99 = vector.broadcast %98 : vector<8x1xf32> to vector<8x8xf32>
      %100 = arith.mulf %95, %99 : vector<8x8xf32>
      %101 = arith.truncf %100 : vector<8x8xf32> to vector<8x8xbf16>
      %102 = arith.truncf %83 : vector<8x16xf32> to vector<8x16xbf16>
      %cst_49 = arith.constant dense<0.000000e+00> : vector<8x16xf32>
      %103 = tpu.matmul %101, %102, %cst_49 {dimension_numbers = #tpu.dot_dimension_numbers<[1], [0], [0], [1], [0, 0, 1, 1], [], []>} : vector<8x8xbf16>, vector<8x16xbf16>, vector<8x16xf32> -> vector<8x16xf32>
      %104 = vector.extract_strided_slice %79 {offsets = [0, 16], sizes = [8, 16], strides = [1, 1]} : vector<16x192xf32> to vector<8x16xf32>
      %105 = vector.extract_strided_slice %79 {offsets = [0, 80], sizes = [8, 16], strides = [1, 1]} : vector<16x192xf32> to vector<8x16xf32>
      %106 = vector.extract_strided_slice %79 {offsets = [0, 144], sizes = [8, 16], strides = [1, 1]} : vector<16x192xf32> to vector<8x16xf32>
      %107 = arith.truncf %104 : vector<8x16xf32> to vector<8x16xbf16>
      %108 = arith.truncf %105 : vector<8x16xf32> to vector<8x16xbf16>
      %cst_50 = arith.constant dense<0.000000e+00> : vector<8x8xf32>
      %109 = tpu.matmul %107, %108, %cst_50 {dimension_numbers = #tpu.dot_dimension_numbers<[1], [1], [0], [0], [0, 0, 1, 0], [], []>} : vector<8x16xbf16>, vector<8x16xbf16>, vector<8x8xf32> -> vector<8x8xf32>
      %cst_51 = arith.constant 2.500000e-01 : f32
      %110 = vector.broadcast %cst_51 : f32 to vector<8x8xf32>
      %111 = arith.mulf %109, %110 : vector<8x8xf32>
      %112 = vector.broadcast %80 : vector<1x8xf32> to vector<8x8xf32>
      %113 = arith.addf %111, %112 : vector<8x8xf32>
      %cst_52 = arith.constant dense<0xFF800000> : vector<8xf32>
      %114 = vector.multi_reduction <maximumf>, %113, %cst_52 [1] : vector<8x8xf32> to vector<8xf32>
      %115 = vector.shape_cast %114 : vector<8xf32> to vector<8x1xf32>
      %116 = vector.broadcast %115 : vector<8x1xf32> to vector<8x8xf32>
      %117 = arith.subf %113, %116 : vector<8x8xf32>
      %118 = math.exp %117 : vector<8x8xf32>
      %cst_53 = arith.constant dense<0.000000e+00> : vector<8xf32>
      %119 = vector.multi_reduction <add>, %118, %cst_53 [1] : vector<8x8xf32> to vector<8xf32>
      %120 = vector.shape_cast %119 : vector<8xf32> to vector<8x1xf32>
      %121 = tpu.reciprocal %120 {approx = true} : vector<8x1xf32> -> vector<8x1xf32>
      %122 = vector.broadcast %121 : vector<8x1xf32> to vector<8x8xf32>
      %123 = arith.mulf %118, %122 : vector<8x8xf32>
      %124 = arith.truncf %123 : vector<8x8xf32> to vector<8x8xbf16>
      %125 = arith.truncf %106 : vector<8x16xf32> to vector<8x16xbf16>
      %cst_54 = arith.constant dense<0.000000e+00> : vector<8x16xf32>
      %126 = tpu.matmul %124, %125, %cst_54 {dimension_numbers = #tpu.dot_dimension_numbers<[1], [0], [0], [1], [0, 0, 1, 1], [], []>} : vector<8x8xbf16>, vector<8x16xbf16>, vector<8x16xf32> -> vector<8x16xf32>
      %127 = vector.extract_strided_slice %79 {offsets = [0, 32], sizes = [8, 16], strides = [1, 1]} : vector<16x192xf32> to vector<8x16xf32>
      %128 = vector.extract_strided_slice %79 {offsets = [0, 96], sizes = [8, 16], strides = [1, 1]} : vector<16x192xf32> to vector<8x16xf32>
      %129 = vector.extract_strided_slice %79 {offsets = [0, 160], sizes = [8, 16], strides = [1, 1]} : vector<16x192xf32> to vector<8x16xf32>
      %130 = arith.truncf %127 : vector<8x16xf32> to vector<8x16xbf16>
      %131 = arith.truncf %128 : vector<8x16xf32> to vector<8x16xbf16>
      %cst_55 = arith.constant dense<0.000000e+00> : vector<8x8xf32>
      %132 = tpu.matmul %130, %131, %cst_55 {dimension_numbers = #tpu.dot_dimension_numbers<[1], [1], [0], [0], [0, 0, 1, 0], [], []>} : vector<8x16xbf16>, vector<8x16xbf16>, vector<8x8xf32> -> vector<8x8xf32>
      %cst_56 = arith.constant 2.500000e-01 : f32
      %133 = vector.broadcast %cst_56 : f32 to vector<8x8xf32>
      %134 = arith.mulf %132, %133 : vector<8x8xf32>
      %135 = vector.broadcast %80 : vector<1x8xf32> to vector<8x8xf32>
      %136 = arith.addf %134, %135 : vector<8x8xf32>
      %cst_57 = arith.constant dense<0xFF800000> : vector<8xf32>
      %137 = vector.multi_reduction <maximumf>, %136, %cst_57 [1] : vector<8x8xf32> to vector<8xf32>
      %138 = vector.shape_cast %137 : vector<8xf32> to vector<8x1xf32>
      %139 = vector.broadcast %138 : vector<8x1xf32> to vector<8x8xf32>
      %140 = arith.subf %136, %139 : vector<8x8xf32>
      %141 = math.exp %140 : vector<8x8xf32>
      %cst_58 = arith.constant dense<0.000000e+00> : vector<8xf32>
      %142 = vector.multi_reduction <add>, %141, %cst_58 [1] : vector<8x8xf32> to vector<8xf32>
      %143 = vector.shape_cast %142 : vector<8xf32> to vector<8x1xf32>
      %144 = tpu.reciprocal %143 {approx = true} : vector<8x1xf32> -> vector<8x1xf32>
      %145 = vector.broadcast %144 : vector<8x1xf32> to vector<8x8xf32>
      %146 = arith.mulf %141, %145 : vector<8x8xf32>
      %147 = arith.truncf %146 : vector<8x8xf32> to vector<8x8xbf16>
      %148 = arith.truncf %129 : vector<8x16xf32> to vector<8x16xbf16>
      %cst_59 = arith.constant dense<0.000000e+00> : vector<8x16xf32>
      %149 = tpu.matmul %147, %148, %cst_59 {dimension_numbers = #tpu.dot_dimension_numbers<[1], [0], [0], [1], [0, 0, 1, 1], [], []>} : vector<8x8xbf16>, vector<8x16xbf16>, vector<8x16xf32> -> vector<8x16xf32>
      %150 = vector.extract_strided_slice %79 {offsets = [0, 48], sizes = [8, 16], strides = [1, 1]} : vector<16x192xf32> to vector<8x16xf32>
      %151 = vector.extract_strided_slice %79 {offsets = [0, 112], sizes = [8, 16], strides = [1, 1]} : vector<16x192xf32> to vector<8x16xf32>
      %152 = vector.extract_strided_slice %79 {offsets = [0, 176], sizes = [8, 16], strides = [1, 1]} : vector<16x192xf32> to vector<8x16xf32>
      %153 = arith.truncf %150 : vector<8x16xf32> to vector<8x16xbf16>
      %154 = arith.truncf %151 : vector<8x16xf32> to vector<8x16xbf16>
      %cst_60 = arith.constant dense<0.000000e+00> : vector<8x8xf32>
      %155 = tpu.matmul %153, %154, %cst_60 {dimension_numbers = #tpu.dot_dimension_numbers<[1], [1], [0], [0], [0, 0, 1, 0], [], []>} : vector<8x16xbf16>, vector<8x16xbf16>, vector<8x8xf32> -> vector<8x8xf32>
      %cst_61 = arith.constant 2.500000e-01 : f32
      %156 = vector.broadcast %cst_61 : f32 to vector<8x8xf32>
      %157 = arith.mulf %155, %156 : vector<8x8xf32>
      %158 = vector.broadcast %80 : vector<1x8xf32> to vector<8x8xf32>
      %159 = arith.addf %157, %158 : vector<8x8xf32>
      %cst_62 = arith.constant dense<0xFF800000> : vector<8xf32>
      %160 = vector.multi_reduction <maximumf>, %159, %cst_62 [1] : vector<8x8xf32> to vector<8xf32>
      %161 = vector.shape_cast %160 : vector<8xf32> to vector<8x1xf32>
      %162 = vector.broadcast %161 : vector<8x1xf32> to vector<8x8xf32>
      %163 = arith.subf %159, %162 : vector<8x8xf32>
      %164 = math.exp %163 : vector<8x8xf32>
      %cst_63 = arith.constant dense<0.000000e+00> : vector<8xf32>
      %165 = vector.multi_reduction <add>, %164, %cst_63 [1] : vector<8x8xf32> to vector<8xf32>
      %166 = vector.shape_cast %165 : vector<8xf32> to vector<8x1xf32>
      %167 = tpu.reciprocal %166 {approx = true} : vector<8x1xf32> -> vector<8x1xf32>
      %168 = vector.broadcast %167 : vector<8x1xf32> to vector<8x8xf32>
      %169 = arith.mulf %164, %168 : vector<8x8xf32>
      %170 = arith.truncf %169 : vector<8x8xf32> to vector<8x8xbf16>
      %171 = arith.truncf %152 : vector<8x16xf32> to vector<8x16xbf16>
      %cst_64 = arith.constant dense<0.000000e+00> : vector<8x16xf32>
      %172 = tpu.matmul %170, %171, %cst_64 {dimension_numbers = #tpu.dot_dimension_numbers<[1], [0], [0], [1], [0, 0, 1, 1], [], []>} : vector<8x8xbf16>, vector<8x16xbf16>, vector<8x16xf32> -> vector<8x16xf32>
      %173 = tpu.concatenate %103, %126, %149, %172 in 1 : vector<8x16xf32>, vector<8x16xf32>, vector<8x16xf32>, vector<8x16xf32> -> vector<8x64xf32>
      %174 = vector.extract_strided_slice %50 {offsets = [1, 0], sizes = [1, 8], strides = [1, 1]} : vector<2x8xf32> to vector<1x8xf32>
      %175 = vector.extract_strided_slice %79 {offsets = [8, 0], sizes = [8, 16], strides = [1, 1]} : vector<16x192xf32> to vector<8x16xf32>
      %176 = vector.extract_strided_slice %79 {offsets = [8, 64], sizes = [8, 16], strides = [1, 1]} : vector<16x192xf32> to vector<8x16xf32>
      %177 = vector.extract_strided_slice %79 {offsets = [8, 128], sizes = [8, 16], strides = [1, 1]} : vector<16x192xf32> to vector<8x16xf32>
      %178 = arith.truncf %175 : vector<8x16xf32> to vector<8x16xbf16>
      %179 = arith.truncf %176 : vector<8x16xf32> to vector<8x16xbf16>
      %cst_65 = arith.constant dense<0.000000e+00> : vector<8x8xf32>
      %180 = tpu.matmul %178, %179, %cst_65 {dimension_numbers = #tpu.dot_dimension_numbers<[1], [1], [0], [0], [0, 0, 1, 0], [], []>} : vector<8x16xbf16>, vector<8x16xbf16>, vector<8x8xf32> -> vector<8x8xf32>
      %cst_66 = arith.constant 2.500000e-01 : f32
      %181 = vector.broadcast %cst_66 : f32 to vector<8x8xf32>
      %182 = arith.mulf %180, %181 : vector<8x8xf32>
      %183 = vector.broadcast %174 : vector<1x8xf32> to vector<8x8xf32>
      %184 = arith.addf %182, %183 : vector<8x8xf32>
      %cst_67 = arith.constant dense<0xFF800000> : vector<8xf32>
      %185 = vector.multi_reduction <maximumf>, %184, %cst_67 [1] : vector<8x8xf32> to vector<8xf32>
      %186 = vector.shape_cast %185 : vector<8xf32> to vector<8x1xf32>
      %187 = vector.broadcast %186 : vector<8x1xf32> to vector<8x8xf32>
      %188 = arith.subf %184, %187 : vector<8x8xf32>
      %189 = math.exp %188 : vector<8x8xf32>
      %cst_68 = arith.constant dense<0.000000e+00> : vector<8xf32>
      %190 = vector.multi_reduction <add>, %189, %cst_68 [1] : vector<8x8xf32> to vector<8xf32>
      %191 = vector.shape_cast %190 : vector<8xf32> to vector<8x1xf32>
      %192 = tpu.reciprocal %191 {approx = true} : vector<8x1xf32> -> vector<8x1xf32>
      %193 = vector.broadcast %192 : vector<8x1xf32> to vector<8x8xf32>
      %194 = arith.mulf %189, %193 : vector<8x8xf32>
      %195 = arith.truncf %194 : vector<8x8xf32> to vector<8x8xbf16>
      %196 = arith.truncf %177 : vector<8x16xf32> to vector<8x16xbf16>
      %cst_69 = arith.constant dense<0.000000e+00> : vector<8x16xf32>
      %197 = tpu.matmul %195, %196, %cst_69 {dimension_numbers = #tpu.dot_dimension_numbers<[1], [0], [0], [1], [0, 0, 1, 1], [], []>} : vector<8x8xbf16>, vector<8x16xbf16>, vector<8x16xf32> -> vector<8x16xf32>
      %198 = vector.extract_strided_slice %79 {offsets = [8, 16], sizes = [8, 16], strides = [1, 1]} : vector<16x192xf32> to vector<8x16xf32>
      %199 = vector.extract_strided_slice %79 {offsets = [8, 80], sizes = [8, 16], strides = [1, 1]} : vector<16x192xf32> to vector<8x16xf32>
      %200 = vector.extract_strided_slice %79 {offsets = [8, 144], sizes = [8, 16], strides = [1, 1]} : vector<16x192xf32> to vector<8x16xf32>
      %201 = arith.truncf %198 : vector<8x16xf32> to vector<8x16xbf16>
      %202 = arith.truncf %199 : vector<8x16xf32> to vector<8x16xbf16>
      %cst_70 = arith.constant dense<0.000000e+00> : vector<8x8xf32>
      %203 = tpu.matmul %201, %202, %cst_70 {dimension_numbers = #tpu.dot_dimension_numbers<[1], [1], [0], [0], [0, 0, 1, 0], [], []>} : vector<8x16xbf16>, vector<8x16xbf16>, vector<8x8xf32> -> vector<8x8xf32>
      %cst_71 = arith.constant 2.500000e-01 : f32
      %204 = vector.broadcast %cst_71 : f32 to vector<8x8xf32>
      %205 = arith.mulf %203, %204 : vector<8x8xf32>
      %206 = vector.broadcast %174 : vector<1x8xf32> to vector<8x8xf32>
      %207 = arith.addf %205, %206 : vector<8x8xf32>
      %cst_72 = arith.constant dense<0xFF800000> : vector<8xf32>
      %208 = vector.multi_reduction <maximumf>, %207, %cst_72 [1] : vector<8x8xf32> to vector<8xf32>
      %209 = vector.shape_cast %208 : vector<8xf32> to vector<8x1xf32>
      %210 = vector.broadcast %209 : vector<8x1xf32> to vector<8x8xf32>
      %211 = arith.subf %207, %210 : vector<8x8xf32>
      %212 = math.exp %211 : vector<8x8xf32>
      %cst_73 = arith.constant dense<0.000000e+00> : vector<8xf32>
      %213 = vector.multi_reduction <add>, %212, %cst_73 [1] : vector<8x8xf32> to vector<8xf32>
      %214 = vector.shape_cast %213 : vector<8xf32> to vector<8x1xf32>
      %215 = tpu.reciprocal %214 {approx = true} : vector<8x1xf32> -> vector<8x1xf32>
      %216 = vector.broadcast %215 : vector<8x1xf32> to vector<8x8xf32>
      %217 = arith.mulf %212, %216 : vector<8x8xf32>
      %218 = arith.truncf %217 : vector<8x8xf32> to vector<8x8xbf16>
      %219 = arith.truncf %200 : vector<8x16xf32> to vector<8x16xbf16>
      %cst_74 = arith.constant dense<0.000000e+00> : vector<8x16xf32>
      %220 = tpu.matmul %218, %219, %cst_74 {dimension_numbers = #tpu.dot_dimension_numbers<[1], [0], [0], [1], [0, 0, 1, 1], [], []>} : vector<8x8xbf16>, vector<8x16xbf16>, vector<8x16xf32> -> vector<8x16xf32>
      %221 = vector.extract_strided_slice %79 {offsets = [8, 32], sizes = [8, 16], strides = [1, 1]} : vector<16x192xf32> to vector<8x16xf32>
      %222 = vector.extract_strided_slice %79 {offsets = [8, 96], sizes = [8, 16], strides = [1, 1]} : vector<16x192xf32> to vector<8x16xf32>
      %223 = vector.extract_strided_slice %79 {offsets = [8, 160], sizes = [8, 16], strides = [1, 1]} : vector<16x192xf32> to vector<8x16xf32>
      %224 = arith.truncf %221 : vector<8x16xf32> to vector<8x16xbf16>
      %225 = arith.truncf %222 : vector<8x16xf32> to vector<8x16xbf16>
      %cst_75 = arith.constant dense<0.000000e+00> : vector<8x8xf32>
      %226 = tpu.matmul %224, %225, %cst_75 {dimension_numbers = #tpu.dot_dimension_numbers<[1], [1], [0], [0], [0, 0, 1, 0], [], []>} : vector<8x16xbf16>, vector<8x16xbf16>, vector<8x8xf32> -> vector<8x8xf32>
      %cst_76 = arith.constant 2.500000e-01 : f32
      %227 = vector.broadcast %cst_76 : f32 to vector<8x8xf32>
      %228 = arith.mulf %226, %227 : vector<8x8xf32>
      %229 = vector.broadcast %174 : vector<1x8xf32> to vector<8x8xf32>
      %230 = arith.addf %228, %229 : vector<8x8xf32>
      %cst_77 = arith.constant dense<0xFF800000> : vector<8xf32>
      %231 = vector.multi_reduction <maximumf>, %230, %cst_77 [1] : vector<8x8xf32> to vector<8xf32>
      %232 = vector.shape_cast %231 : vector<8xf32> to vector<8x1xf32>
      %233 = vector.broadcast %232 : vector<8x1xf32> to vector<8x8xf32>
      %234 = arith.subf %230, %233 : vector<8x8xf32>
      %235 = math.exp %234 : vector<8x8xf32>
      %cst_78 = arith.constant dense<0.000000e+00> : vector<8xf32>
      %236 = vector.multi_reduction <add>, %235, %cst_78 [1] : vector<8x8xf32> to vector<8xf32>
      %237 = vector.shape_cast %236 : vector<8xf32> to vector<8x1xf32>
      %238 = tpu.reciprocal %237 {approx = true} : vector<8x1xf32> -> vector<8x1xf32>
      %239 = vector.broadcast %238 : vector<8x1xf32> to vector<8x8xf32>
      %240 = arith.mulf %235, %239 : vector<8x8xf32>
      %241 = arith.truncf %240 : vector<8x8xf32> to vector<8x8xbf16>
      %242 = arith.truncf %223 : vector<8x16xf32> to vector<8x16xbf16>
      %cst_79 = arith.constant dense<0.000000e+00> : vector<8x16xf32>
      %243 = tpu.matmul %241, %242, %cst_79 {dimension_numbers = #tpu.dot_dimension_numbers<[1], [0], [0], [1], [0, 0, 1, 1], [], []>} : vector<8x8xbf16>, vector<8x16xbf16>, vector<8x16xf32> -> vector<8x16xf32>
      %244 = vector.extract_strided_slice %79 {offsets = [8, 48], sizes = [8, 16], strides = [1, 1]} : vector<16x192xf32> to vector<8x16xf32>
      %245 = vector.extract_strided_slice %79 {offsets = [8, 112], sizes = [8, 16], strides = [1, 1]} : vector<16x192xf32> to vector<8x16xf32>
      %246 = vector.extract_strided_slice %79 {offsets = [8, 176], sizes = [8, 16], strides = [1, 1]} : vector<16x192xf32> to vector<8x16xf32>
      %247 = arith.truncf %244 : vector<8x16xf32> to vector<8x16xbf16>
      %248 = arith.truncf %245 : vector<8x16xf32> to vector<8x16xbf16>
      %cst_80 = arith.constant dense<0.000000e+00> : vector<8x8xf32>
      %249 = tpu.matmul %247, %248, %cst_80 {dimension_numbers = #tpu.dot_dimension_numbers<[1], [1], [0], [0], [0, 0, 1, 0], [], []>} : vector<8x16xbf16>, vector<8x16xbf16>, vector<8x8xf32> -> vector<8x8xf32>
      %cst_81 = arith.constant 2.500000e-01 : f32
      %250 = vector.broadcast %cst_81 : f32 to vector<8x8xf32>
      %251 = arith.mulf %249, %250 : vector<8x8xf32>
      %252 = vector.broadcast %174 : vector<1x8xf32> to vector<8x8xf32>
      %253 = arith.addf %251, %252 : vector<8x8xf32>
      %cst_82 = arith.constant dense<0xFF800000> : vector<8xf32>
      %254 = vector.multi_reduction <maximumf>, %253, %cst_82 [1] : vector<8x8xf32> to vector<8xf32>
      %255 = vector.shape_cast %254 : vector<8xf32> to vector<8x1xf32>
      %256 = vector.broadcast %255 : vector<8x1xf32> to vector<8x8xf32>
      %257 = arith.subf %253, %256 : vector<8x8xf32>
      %258 = math.exp %257 : vector<8x8xf32>
      %cst_83 = arith.constant dense<0.000000e+00> : vector<8xf32>
      %259 = vector.multi_reduction <add>, %258, %cst_83 [1] : vector<8x8xf32> to vector<8xf32>
      %260 = vector.shape_cast %259 : vector<8xf32> to vector<8x1xf32>
      %261 = tpu.reciprocal %260 {approx = true} : vector<8x1xf32> -> vector<8x1xf32>
      %262 = vector.broadcast %261 : vector<8x1xf32> to vector<8x8xf32>
      %263 = arith.mulf %258, %262 : vector<8x8xf32>
      %264 = arith.truncf %263 : vector<8x8xf32> to vector<8x8xbf16>
      %265 = arith.truncf %246 : vector<8x16xf32> to vector<8x16xbf16>
      %cst_84 = arith.constant dense<0.000000e+00> : vector<8x16xf32>
      %266 = tpu.matmul %264, %265, %cst_84 {dimension_numbers = #tpu.dot_dimension_numbers<[1], [0], [0], [1], [0, 0, 1, 1], [], []>} : vector<8x8xbf16>, vector<8x16xbf16>, vector<8x16xf32> -> vector<8x16xf32>
      %267 = tpu.concatenate %197, %220, %243, %266 in 1 : vector<8x16xf32>, vector<8x16xf32>, vector<8x16xf32>, vector<8x16xf32> -> vector<8x64xf32>
      %268 = tpu.concatenate %173, %267 in 0 : vector<8x64xf32>, vector<8x64xf32> -> vector<16x64xf32>
      %269 = arith.index_cast %arg25 : i32 to index
      %c0_85 = arith.constant 0 : index
      %c0_86 = arith.constant 0 : index
      %270 = vector.load %arg10[%269, %c0_85, %c0_86] : memref<2x64x64xbf16, #tpu.memory_space<vmem>>, vector<1x64x64xbf16>
      %271 = vector.shape_cast %270 : vector<1x64x64xbf16> to vector<64x64xbf16>
      %272 = arith.index_cast %arg25 : i32 to index
      %c0_87 = arith.constant 0 : index
      %c0_88 = arith.constant 0 : index
      %273 = vector.load %arg11[%272, %c0_87, %c0_88] : memref<2x1x64xf32, #tpu.memory_space<vmem>>, vector<1x1x64xf32>
      %274 = vector.shape_cast %273 : vector<1x1x64xf32> to vector<1x64xf32>
      %275 = arith.truncf %268 : vector<16x64xf32> to vector<16x64xbf16>
      %cst_89 = arith.constant dense<0.000000e+00> : vector<16x64xf32>
      %276 = tpu.matmul %275, %271, %cst_89 {dimension_numbers = #tpu.dot_dimension_numbers<[1], [0], [0], [1], [0, 0, 1, 1], [], []>} : vector<16x64xbf16>, vector<64x64xbf16>, vector<16x64xf32> -> vector<16x64xf32>
      %277 = vector.broadcast %274 : vector<1x64xf32> to vector<16x64xf32>
      %278 = arith.addf %276, %277 : vector<16x64xf32>
      %279 = arith.addf %278, %arg26 : vector<16x64xf32>
      %280 = arith.index_cast %arg25 : i32 to index
      %c0_90 = arith.constant 0 : index
      %c0_91 = arith.constant 0 : index
      %281 = vector.load %arg12[%280, %c0_90, %c0_91] : memref<2x1x64xf32, #tpu.memory_space<vmem>>, vector<1x1x64xf32>
      %282 = vector.shape_cast %281 : vector<1x1x64xf32> to vector<1x64xf32>
      %283 = arith.index_cast %arg25 : i32 to index
      %c0_92 = arith.constant 0 : index
      %c0_93 = arith.constant 0 : index
      %284 = vector.load %arg13[%283, %c0_92, %c0_93] : memref<2x1x64xf32, #tpu.memory_space<vmem>>, vector<1x1x64xf32>
      %285 = vector.shape_cast %284 : vector<1x1x64xf32> to vector<1x64xf32>
      %cst_94 = arith.constant dense<0.000000e+00> : vector<16xf32>
      %286 = vector.multi_reduction <add>, %279, %cst_94 [1] : vector<16x64xf32> to vector<16xf32>
      %287 = vector.shape_cast %286 : vector<16xf32> to vector<16x1xf32>
      %cst_95 = arith.constant 6.400000e+01 : f32
      %288 = vector.broadcast %cst_95 : f32 to vector<16x1xf32>
      %289 = arith.divf %287, %288 : vector<16x1xf32>
      %290 = vector.broadcast %289 : vector<16x1xf32> to vector<16x64xf32>
      %291 = arith.subf %279, %290 : vector<16x64xf32>
      %292 = arith.mulf %291, %291 : vector<16x64xf32>
      %cst_96 = arith.constant dense<0.000000e+00> : vector<16xf32>
      %293 = vector.multi_reduction <add>, %292, %cst_96 [1] : vector<16x64xf32> to vector<16xf32>
      %294 = vector.shape_cast %293 : vector<16xf32> to vector<16x1xf32>
      %cst_97 = arith.constant 6.400000e+01 : f32
      %295 = vector.broadcast %cst_97 : f32 to vector<16x1xf32>
      %296 = arith.divf %294, %295 : vector<16x1xf32>
      %cst_98 = arith.constant 9.99999974E-6 : f32
      %297 = vector.broadcast %cst_98 : f32 to vector<16x1xf32>
      %298 = arith.addf %296, %297 : vector<16x1xf32>
      %299 = math.rsqrt %298 : vector<16x1xf32>
      %300 = vector.broadcast %299 : vector<16x1xf32> to vector<16x64xf32>
      %301 = arith.mulf %291, %300 : vector<16x64xf32>
      %302 = vector.broadcast %282 : vector<1x64xf32> to vector<16x64xf32>
      %303 = arith.mulf %301, %302 : vector<16x64xf32>
      %304 = vector.broadcast %285 : vector<1x64xf32> to vector<16x64xf32>
      %305 = arith.addf %303, %304 : vector<16x64xf32>
      %306 = arith.index_cast %arg25 : i32 to index
      %c0_99 = arith.constant 0 : index
      %c0_100 = arith.constant 0 : index
      %307 = vector.load %arg14[%306, %c0_99, %c0_100] : memref<2x64x128xbf16, #tpu.memory_space<vmem>>, vector<1x64x128xbf16>
      %308 = vector.shape_cast %307 : vector<1x64x128xbf16> to vector<64x128xbf16>
      %309 = arith.index_cast %arg25 : i32 to index
      %c0_101 = arith.constant 0 : index
      %c0_102 = arith.constant 0 : index
      %310 = vector.load %arg15[%309, %c0_101, %c0_102] : memref<2x1x128xf32, #tpu.memory_space<vmem>>, vector<1x1x128xf32>
      %311 = vector.shape_cast %310 : vector<1x1x128xf32> to vector<1x128xf32>
      %312 = arith.truncf %305 : vector<16x64xf32> to vector<16x64xbf16>
      %cst_103 = arith.constant dense<0.000000e+00> : vector<16x128xf32>
      %313 = tpu.matmul %312, %308, %cst_103 {dimension_numbers = #tpu.dot_dimension_numbers<[1], [0], [0], [1], [0, 0, 1, 1], [], []>} : vector<16x64xbf16>, vector<64x128xbf16>, vector<16x128xf32> -> vector<16x128xf32>
      %314 = vector.broadcast %311 : vector<1x128xf32> to vector<16x128xf32>
      %315 = arith.addf %313, %314 : vector<16x128xf32>
      %cst_104 = arith.constant 5.000000e-01 : f32
      %316 = vector.broadcast %cst_104 : f32 to vector<16x128xf32>
      %317 = arith.mulf %316, %315 : vector<16x128xf32>
      %cst_105 = arith.constant 0.707106769 : f32
      %318 = vector.broadcast %cst_105 : f32 to vector<16x128xf32>
      %319 = arith.mulf %315, %318 : vector<16x128xf32>
      %cst_106 = arith.constant 0.000000e+00 : f32
      %320 = vector.broadcast %cst_106 : f32 to vector<16x128xf32>
      %321 = arith.cmpf oge, %319, %320 : vector<16x128xf32>
      %cst_107 = arith.constant 1.000000e+00 : f32
      %cst_108 = arith.constant -1.000000e+00 : f32
      %322 = vector.broadcast %cst_107 : f32 to vector<16x128xf32>
      %323 = vector.broadcast %cst_108 : f32 to vector<16x128xf32>
      %324 = arith.select %321, %322, %323 : vector<16x128xi1>, vector<16x128xf32>
      %325 = math.absf %319 : vector<16x128xf32>
      %cst_109 = arith.constant 0.327591091 : f32
      %326 = vector.broadcast %cst_109 : f32 to vector<16x128xf32>
      %327 = arith.mulf %326, %325 : vector<16x128xf32>
      %cst_110 = arith.constant 1.000000e+00 : f32
      %328 = vector.broadcast %cst_110 : f32 to vector<16x128xf32>
      %329 = arith.addf %328, %327 : vector<16x128xf32>
      %cst_111 = arith.constant 1.000000e+00 : f32
      %330 = vector.broadcast %cst_111 : f32 to vector<16x128xf32>
      %331 = arith.divf %330, %329 : vector<16x128xf32>
      %cst_112 = arith.constant 1.06140542 : f32
      %332 = vector.broadcast %cst_112 : f32 to vector<16x128xf32>
      %333 = arith.mulf %331, %332 : vector<16x128xf32>
      %cst_113 = arith.constant -1.45315206 : f32
      %334 = vector.broadcast %cst_113 : f32 to vector<16x128xf32>
      %335 = arith.addf %334, %333 : vector<16x128xf32>
      %336 = arith.mulf %331, %335 : vector<16x128xf32>
      %cst_114 = arith.constant 1.42141378 : f32
      %337 = vector.broadcast %cst_114 : f32 to vector<16x128xf32>
      %338 = arith.addf %337, %336 : vector<16x128xf32>
      %339 = arith.mulf %331, %338 : vector<16x128xf32>
      %cst_115 = arith.constant -0.284496725 : f32
      %340 = vector.broadcast %cst_115 : f32 to vector<16x128xf32>
      %341 = arith.addf %340, %339 : vector<16x128xf32>
      %342 = arith.mulf %331, %341 : vector<16x128xf32>
      %cst_116 = arith.constant 0.254829586 : f32
      %343 = vector.broadcast %cst_116 : f32 to vector<16x128xf32>
      %344 = arith.addf %343, %342 : vector<16x128xf32>
      %345 = arith.mulf %331, %344 : vector<16x128xf32>
      %cst_117 = arith.constant 0.000000e+00 : f32
      %346 = vector.broadcast %cst_117 : f32 to vector<16x128xf32>
      %347 = arith.subf %346, %325 : vector<16x128xf32>
      %348 = arith.mulf %347, %325 : vector<16x128xf32>
      %349 = math.exp %348 : vector<16x128xf32>
      %350 = arith.mulf %345, %349 : vector<16x128xf32>
      %cst_118 = arith.constant 1.000000e+00 : f32
      %351 = vector.broadcast %cst_118 : f32 to vector<16x128xf32>
      %352 = arith.subf %351, %350 : vector<16x128xf32>
      %353 = arith.mulf %324, %352 : vector<16x128xf32>
      %cst_119 = arith.constant 1.000000e+00 : f32
      %354 = vector.broadcast %cst_119 : f32 to vector<16x128xf32>
      %355 = arith.addf %354, %353 : vector<16x128xf32>
      %356 = arith.mulf %317, %355 : vector<16x128xf32>
      %357 = arith.index_cast %arg25 : i32 to index
      %c0_120 = arith.constant 0 : index
      %c0_121 = arith.constant 0 : index
      %358 = vector.load %arg16[%357, %c0_120, %c0_121] : memref<2x128x64xbf16, #tpu.memory_space<vmem>>, vector<1x128x64xbf16>
      %359 = vector.shape_cast %358 : vector<1x128x64xbf16> to vector<128x64xbf16>
      %360 = arith.index_cast %arg25 : i32 to index
      %c0_122 = arith.constant 0 : index
      %c0_123 = arith.constant 0 : index
      %361 = vector.load %arg17[%360, %c0_122, %c0_123] : memref<2x1x64xf32, #tpu.memory_space<vmem>>, vector<1x1x64xf32>
      %362 = vector.shape_cast %361 : vector<1x1x64xf32> to vector<1x64xf32>
      %363 = arith.truncf %356 : vector<16x128xf32> to vector<16x128xbf16>
      %cst_124 = arith.constant dense<0.000000e+00> : vector<16x64xf32>
      %364 = tpu.matmul %363, %359, %cst_124 {dimension_numbers = #tpu.dot_dimension_numbers<[1], [0], [0], [1], [0, 0, 1, 1], [], []>} : vector<16x128xbf16>, vector<128x64xbf16>, vector<16x64xf32> -> vector<16x64xf32>
      %365 = vector.broadcast %362 : vector<1x64xf32> to vector<16x64xf32>
      %366 = arith.addf %364, %365 : vector<16x64xf32>
      %367 = arith.addf %366, %305 : vector<16x64xf32>
      %368 = arith.index_cast %arg25 : i32 to index
      %c0_125 = arith.constant 0 : index
      %c0_126 = arith.constant 0 : index
      %369 = vector.load %arg18[%368, %c0_125, %c0_126] : memref<2x1x64xf32, #tpu.memory_space<vmem>>, vector<1x1x64xf32>
      %370 = vector.shape_cast %369 : vector<1x1x64xf32> to vector<1x64xf32>
      %371 = arith.index_cast %arg25 : i32 to index
      %c0_127 = arith.constant 0 : index
      %c0_128 = arith.constant 0 : index
      %372 = vector.load %arg19[%371, %c0_127, %c0_128] : memref<2x1x64xf32, #tpu.memory_space<vmem>>, vector<1x1x64xf32>
      %373 = vector.shape_cast %372 : vector<1x1x64xf32> to vector<1x64xf32>
      %cst_129 = arith.constant dense<0.000000e+00> : vector<16xf32>
      %374 = vector.multi_reduction <add>, %367, %cst_129 [1] : vector<16x64xf32> to vector<16xf32>
      %375 = vector.shape_cast %374 : vector<16xf32> to vector<16x1xf32>
      %cst_130 = arith.constant 6.400000e+01 : f32
      %376 = vector.broadcast %cst_130 : f32 to vector<16x1xf32>
      %377 = arith.divf %375, %376 : vector<16x1xf32>
      %378 = vector.broadcast %377 : vector<16x1xf32> to vector<16x64xf32>
      %379 = arith.subf %367, %378 : vector<16x64xf32>
      %380 = arith.mulf %379, %379 : vector<16x64xf32>
      %cst_131 = arith.constant dense<0.000000e+00> : vector<16xf32>
      %381 = vector.multi_reduction <add>, %380, %cst_131 [1] : vector<16x64xf32> to vector<16xf32>
      %382 = vector.shape_cast %381 : vector<16xf32> to vector<16x1xf32>
      %cst_132 = arith.constant 6.400000e+01 : f32
      %383 = vector.broadcast %cst_132 : f32 to vector<16x1xf32>
      %384 = arith.divf %382, %383 : vector<16x1xf32>
      %cst_133 = arith.constant 9.99999974E-6 : f32
      %385 = vector.broadcast %cst_133 : f32 to vector<16x1xf32>
      %386 = arith.addf %384, %385 : vector<16x1xf32>
      %387 = math.rsqrt %386 : vector<16x1xf32>
      %388 = vector.broadcast %387 : vector<16x1xf32> to vector<16x64xf32>
      %389 = arith.mulf %379, %388 : vector<16x64xf32>
      %390 = vector.broadcast %370 : vector<1x64xf32> to vector<16x64xf32>
      %391 = arith.mulf %389, %390 : vector<16x64xf32>
      %392 = vector.broadcast %373 : vector<1x64xf32> to vector<16x64xf32>
      %393 = arith.addf %391, %392 : vector<16x64xf32>
      scf.yield %393 : vector<16x64xf32>
    }
    %c2_i32_27 = arith.constant 2 : i32
    %53 = vector.extract_strided_slice %52 {offsets = [0, 0], sizes = [1, 64], strides = [1, 1]} : vector<16x64xf32> to vector<1x64xf32>
    %54 = vector.extract_strided_slice %52 {offsets = [8, 0], sizes = [1, 64], strides = [1, 1]} : vector<16x64xf32> to vector<1x64xf32>
    %55 = tpu.concatenate %53, %54 in 0 : vector<1x64xf32>, vector<1x64xf32> -> vector<2x64xf32>
    %c0_28 = arith.constant 0 : index
    %c0_29 = arith.constant 0 : index
    %56 = vector.load %arg20[%c0_28, %c0_29] : memref<64x64xbf16, #tpu.memory_space<vmem>>, vector<64x64xbf16>
    %c0_30 = arith.constant 0 : index
    %c0_31 = arith.constant 0 : index
    %57 = vector.load %arg21[%c0_30, %c0_31] : memref<1x64xf32, #tpu.memory_space<vmem>>, vector<1x64xf32>
    %58 = arith.truncf %55 : vector<2x64xf32> to vector<2x64xbf16>
    %cst_32 = arith.constant dense<0.000000e+00> : vector<2x64xf32>
    %59 = tpu.matmul %58, %56, %cst_32 {dimension_numbers = #tpu.dot_dimension_numbers<[1], [0], [0], [1], [0, 0, 1, 1], [], []>} : vector<2x64xbf16>, vector<64x64xbf16>, vector<2x64xf32> -> vector<2x64xf32>
    %60 = vector.broadcast %57 : vector<1x64xf32> to vector<2x64xf32>
    %61 = arith.addf %59, %60 : vector<2x64xf32>
    %62 = math.tanh %61 : vector<2x64xf32>
    %c0_33 = arith.constant 0 : index
    %c0_34 = arith.constant 0 : index
    %63 = vector.load %arg22[%c0_33, %c0_34] : memref<64x128xbf16, #tpu.memory_space<vmem>>, vector<64x128xbf16>
    %c0_35 = arith.constant 0 : index
    %c0_36 = arith.constant 0 : index
    %64 = vector.load %arg23[%c0_35, %c0_36] : memref<1x128xf32, #tpu.memory_space<vmem>>, vector<1x128xf32>
    %65 = arith.truncf %62 : vector<2x64xf32> to vector<2x64xbf16>
    %cst_37 = arith.constant dense<0.000000e+00> : vector<2x128xf32>
    %66 = tpu.matmul %65, %63, %cst_37 {dimension_numbers = #tpu.dot_dimension_numbers<[1], [0], [0], [1], [0, 0, 1, 1], [], []>} : vector<2x64xbf16>, vector<64x128xbf16>, vector<2x128xf32> -> vector<2x128xf32>
    %67 = vector.broadcast %64 : vector<1x128xf32> to vector<2x128xf32>
    %68 = arith.addf %66, %67 : vector<2x128xf32>
    %c0_38 = arith.constant 0 : index
    %c0_39 = arith.constant 0 : index
    %69 = vector.load %arg24[%c0_38, %c0_39] : memref<2x128xf32, #tpu.memory_space<vmem>>, vector<2x128xf32>
    tpu.vector_store %arg24[%c0_38, %c0_39], %68 {strides = array<i32>} : memref<2x128xf32, #tpu.memory_space<vmem>>, vector<2x128xf32>,
    return
  }
}

</mosaic_0001>

<bundles_post_ra>
// kernel: xlm_roberta_classify.1
= control target key start
LH: loop header
LB: loop body
LE: loop exit
PB: predicated region body
PF: predicated region fallthrough
CT: control target
= control target key end

     0   :  { %s2342_s0 = inlined_call_operand.vmem [shape: s32[16,1], index: 0, kind: input, shape index: {}]   ;;  %s2343_s1 = inlined_call_operand.vmem [shape: s32[16,1], index: 1, kind: input, shape index: {}]   ;;  %s2344_s2 = inlined_call_operand.vmem [shape: f32[2,8], index: 2, kind: input, shape index: {}]   ;;  %s2345_s3 = inlined_call_operand.vmem [shape: bf16[64,64], index: 3, kind: input, shape index: {}]   ;;  %s2346_s4 = inlined_call_operand.vmem [shape: bf16[32,64], index: 4, kind: input, shape index: {}]   ;;  %s2347_s5 = inlined_call_operand.vmem [shape: f32[1,64], index: 5, kind: input, shape index: {}]   ;;  %s2348_s6 = inlined_call_operand.vmem [shape: f32[1,64], index: 6, kind: input, shape index: {}]   ;;  %s2349_s7 = inlined_call_operand.vmem [shape: f32[1,64], index: 7, kind: input, shape index: {}]   ;;  %s2350_s8 = inlined_call_operand.vmem [shape: bf16[2,64,192], index: 8, kind: input, shape index: {}]   ;;  %s2351_s9 = inlined_call_operand.vmem [shape: f32[2,1,192], index: 9, kind: input, shape index: {}]   ;;  %s2352_s10 = inlined_call_operand.vmem [shape: bf16[2,64,64], index: 10, kind: input, shape index: {}]   ;;  %s2353_s11 = inlined_call_operand.vmem [shape: f32[2,1,64], index: 11, kind: input, shape index: {}]   ;;  %s2354_s12 = inlined_call_operand.vmem [shape: f32[2,1,64], index: 12, kind: input, shape index: {}]   ;;  %s2355_s13 = inlined_call_operand.vmem [shape: f32[2,1,64], index: 13, kind: input, shape index: {}]   ;;  %s2356_s14 = inlined_call_operand.vmem [shape: bf16[2,64,128], index: 14, kind: input, shape index: {}]   ;;  %s2357_s15 = inlined_call_operand.vmem [shape: f32[2,1,128], index: 15, kind: input, shape index: {}]   ;;  %s2358_s16 = inlined_call_operand.vmem [shape: bf16[2,128,64], index: 16, kind: input, shape index: {}]   ;;  %s2359_s17 = inlined_call_operand.vmem [shape: f32[2,1,64], index: 17, kind: input, shape index: {}]   ;;  %s2360_s18 = inlined_call_operand.vmem [shape: f32[2,1,64], index: 18, kind: input, shape index: {}]   ;;  %s2361_s19 = inlined_call_operand.vmem [shape: f32[2,1,64], index: 19, kind: input, shape index: {}]   ;;  %s2362_s20 = inlined_call_operand.vmem [shape: bf16[64,64], index: 20, kind: input, shape index: {}]   ;;  %s2363_s21 = inlined_call_operand.vmem [shape: f32[1,64], index: 21, kind: input, shape index: {}]   ;;  %s2364_s22 = inlined_call_operand.vmem [shape: bf16[64,128], index: 22, kind: input, shape index: {}]   ;;  %s2365_s23 = inlined_call_operand.vmem [shape: f32[1,128], index: 23, kind: input, shape index: {}]   ;;  %s2366_s24 = inlined_call_operand.hbm [shape: f32[2,128], index: 24, kind: output, shape index: {}]  }
   0x1   :  { %2372 = sst [smem:[#allocation5_spill]] %s2342_s0 }
   0x2   :  { %2373 = sst [smem:[#allocation6_spill]] %s2343_s1 }
   0x3   :  { %2374 = sst [smem:[#allocation7_spill]] %s2344_s2 }
   0x4   :  { %2375 = sst [smem:[#allocation8_spill]] %s2345_s3 }
   0x5   :  { %2376 = sst [smem:[#allocation9_spill]] %s2346_s4 }
   0x6   :  { %2377 = sst [smem:[#allocation10_spill]] %s2347_s5 }
   0x7   :  { %2378 = sst [smem:[#allocation11_spill]] %s2348_s6 }
   0x8   :  { %2379 = sst [smem:[#allocation12_spill]] %s2349_s7 }
   0x9   :  { %2380 = sst [smem:[#allocation13_spill]] %s2350_s8 }
   0xa   :  { %2381 = sst [smem:[#allocation14_spill]] %s2361_s19 }
   0xb   :  { %s2382_s27 = sld [smem:[#allocation6_spill]]  ;;  %v1816_v2 = vmov 0  }
   0xc   :  { %s2383_s19 = sld [smem:[#allocation5_spill]]  ;;  %1682 = vset.pattern.permute.xlu1 %v1816_v2  ;;  %1681 = vset.pattern.permute.xlu0 %v1816_v2 }
   0xd   :  { %s2384_s0 = sld [smem:[#allocation8_spill]] }
  0x11   :  { %v81_v0 = vld [vmem:[%s2382_s27] sm:$0xff] }
  0x12   :  { %v79_v1 = vld [vmem:[%s2383_s19] sm:$0xff] }
  0x13   :  { %v1606_v3 = vld [vmem:[%s2384_s0 + $0x18] sm:$0xff] }
  0x14   :  { %29 = vsyncpa [#allocation3], 0  ;;  %96 = vperm.xlu1 %1682, %v81_v0   ;;  %86 = vperm.xlu0 %1681, %v79_v1   ;;  %v82_v4 = vld [vmem:[%s2382_s27 + $0x8] sm:$0xff]  ;;  %v1605_v6 = vld [vmem:[%s2384_s0 + $0x10] sm:$0xff]  ;;  %s2385_s26 = sld [smem:[#allocation9_spill]]  ;;  %v83_v11 = vlaneseq  ;;  %vm131_vm4 = vcmask 261120  }
  0x15   :  { %181 = vmatpush.bf16.msra.mxu1 %v1606_v3  ;;  %v80_v5 = vld [vmem:[%s2383_s19 + $0x8] sm:$0xff]  ;;  %v1603_v10 = vld [vmem:[%s2384_s0] sm:$0xff]  ;;  %vm173_vm5 = vcmask 523264   ;;  %v1817_v17 = vmov 0.0   ;;  %s2386_s30 = sld [smem:[#allocation10_spill]]  ;;  %v1818_v35 = vmov 64.0  }
  0x16   :  { %v1604_v8 = vld [vmem:[%s2384_s0 + $0x8] sm:$0xff]  ;;  %v84_v14 = vand.u32 127, %v83_v11  ;;  %1686 = vrcp.f32 %v1818_v35  ;;  %s2387_s8 = sld [smem:[#allocation7_spill]]  ;;  %s2013_s27 = smov 0  }
  0x17   :  { %s2388_s5 = sld [smem:[#allocation11_spill]] }
  0x18   :  { %s2389_s6 = sld [smem:[#allocation12_spill]] }
  0x19   :  { %182 = vmatpush.bf16.msra.mxu1 %v1605_v6 }
  0x1a   :  { %v1608_v7 = vld [vmem:[%s2385_s26 + $0x8] sm:$0xff]  ;;  %v1607_v9 = vld [vmem:[%s2385_s26] sm:$0xff] }
  0x1b   :  { %141 = vmatpush.bf16.msra.mxu0 %v1608_v7  ;;  %v1683_v24 = vld [vmem:[%s2386_s30] ss:$0 sm:$0xff] }
  0x1c   :  { %99 = vperm.xlu1 %1682, %v82_v4   ;;  %89 = vperm.xlu0 %1681, %v80_v5   ;;  %v1687_v36 = vpop.eup %1686  ;;  %v260_v53 = vld [vmem:[%s2387_s8] sm:$0x3] }
  0x1d   :  { %183 = vmatpush.bf16.msra.mxu1 %v1604_v8  ;;  %v206_v37 = vmul.f32 64.0, %v1687_v36  ;;  %vm210_vm6 = vweird.f32 %v1687_v36  ;;  %v261_v55 = vsub.f32 1.0, %v260_v53  ;;  %v1684_v5 = vld [vmem:[%s2388_s5] ss:$0 sm:$0xff] }
  0x1e   :  { %v1685_v8 = vld [vmem:[%s2389_s6] ss:$0 sm:$0xff] }
  0x1f   :  { %142 = vmatpush.bf16.msra.mxu0 %v1607_v9  ;;  %v207_v38 = vsub.f32 1.0, %v206_v37  ;;  %v2000_v57 = vmul.f32 -1e+09, %v261_v55 }
  0x21   :  { %184 = vmatpush.bf16.msra.mxu1 %v1603_v10  ;;  %v208_v39 = vmul.f32 %v1687_v36, %v207_v38 }
  0x23   :  { %v209_v40 = vadd.f32 %v1687_v36, %v208_v39 }
  0x25   :  { %v1990_v41 = vsel %vm210_vm6, %v1687_v36, %v209_v40 }
  0x86   :  { %v97_v12 = vpop.permute.xlu1 %96  ;;  %v87_v13 = vpop.permute.xlu0 %86 }
  0x87   :  { %vm101_vm0 = vcmp.eq.s32.totalorder %v84_v14, %v97_v12  ;;  %vm91_vm1 = vcmp.eq.s32.totalorder %v84_v14, %v87_v13 }
  0x88   :  { %v103_v18 = vsel %vm101_vm0, 1.0, %v1817_v17  ;;  %v93_v19 = vsel %vm91_vm1, 1.0, %v1817_v17 }
  0x8e   :  { %v100_v15 = vpop.permute.xlu1 %99  ;;  %v90_v16 = vpop.permute.xlu0 %89 }
  0x8f   :  { %vm102_vm2 = vcmp.eq.s32.totalorder %v84_v14, %v100_v15  ;;  %vm92_vm3 = vcmp.eq.s32.totalorder %v84_v14, %v90_v16 }
  0x90   :  { %v104_v20 = vsel %vm102_vm2, 1.0, %v1817_v17  ;;  %v94_v21 = vsel %vm92_vm3, 1.0, %v1817_v17 }
  0x91   :  { %v118_v22 = vpack.c.bf16 %v104_v20, %v103_v18  ;;  %v113_v23 = vpack.c.bf16 %v94_v21, %v93_v19 }
  0x93   :  { %1428 = vmatmul.msk.bf16.vlgmr.msra.gmra.mxu0 %vm131_vm4, %v118_v22  ;;  %1445 = vmatmul.msk.bf16.vlgmr.msra.gmra.mxu1 %vm173_vm5, %v113_v23 }
 0x110   :  { %v144_v25 = vpop.f32.mrf.mxu0  ;;  %v186_v26 = vpop.f32.mrf.mxu1 }
 0x111   :  { %v187_v27 = vadd.f32 %v186_v26, %v144_v25 }
 0x113   :  { %v195_v28 = vadd.f32 %v1683_v24, %v187_v27 }
 0x115   :  { %v199_v29 = vsel %vm173_vm5, %v195_v28, 0.0 }
 0x116   :  { %200 = vadd.xlane.f32.xlu2 %v199_v29 }
 0x118   :  { %v146_v30 = vpop.f32.mrf.mxu0  ;;  %v188_v31 = vpop.f32.mrf.mxu1 }
 0x119   :  { %v189_v32 = vadd.f32 %v188_v31, %v146_v30 }
 0x11b   :  { %v196_v33 = vadd.f32 %v1683_v24, %v189_v32 }
 0x11d   :  { %v202_v34 = vsel %vm173_vm5, %v196_v33, 0.0 }
 0x11e   :  { %203 = vadd.xlane.f32.xlu2 %v202_v34 }
 0x189   :  { %v201_v42 = vpop.xlane.xlu2 %200 }
 0x18a   :  { %v212_v43 = vmul.f32 %v1990_v41, %v201_v42 }
 0x18c   :  { %v214_v44 = vsub.f32 %v195_v28, %v212_v43 }
 0x18e   :  { %v216_v45 = vmul.f32 %v214_v44, %v214_v44 }
 0x190   :  { %v218_v46 = vsel %vm173_vm5, %v216_v45, 0.0 }
 0x191   :  { %219 = vadd.xlane.f32.xlu0 %v218_v46  ;;  %v204_v47 = vpop.xlane.xlu2 %203 }
 0x192   :  { %v213_v48 = vmul.f32 %v1990_v41, %v204_v47 }
 0x194   :  { %v215_v49 = vsub.f32 %v196_v33, %v213_v48 }
 0x196   :  { %v217_v50 = vmul.f32 %v215_v49, %v215_v49 }
 0x198   :  { %v221_v51 = vsel %vm173_vm5, %v217_v50, 0.0 }
 0x199   :  { %222 = vadd.xlane.f32.xlu1 %v221_v51 }
 0x204   :  { %v220_v52 = vpop.xlane.xlu0 %219 }
 0x205   :  { %v224_v54 = vmul.f32 %v220_v52, %v1990_v41 }
 0x207   :  { %v226_v56 = vadd.f32 1e-05, %v224_v54 }
 0x209   :  { %1688 = vrsqrt.f32 %v226_v56  ;;  %vm234_vm8 = vweird.f32 %v226_v56 }
 0x20c   :  { %v223_v58 = vpop.xlane.xlu1 %222 }
 0x20d   :  { %v225_v59 = vmul.f32 %v223_v58, %v1990_v41 }
 0x20f   :  { %v1689_v60 = vpop.eup %1688  ;;  %v227_v61 = vadd.f32 1e-05, %v225_v59 }
 0x210   :  { %v229_v62 = vmul.f32 %v1689_v60, %v226_v56  ;;  %vm235_vm7 = vweird.f32 %v1689_v60 }
 0x211   :  { %1690 = vrsqrt.f32 %v227_v61  ;;  %vm236_vm9 = vmor %vm234_vm8, %vm235_vm7  ;;  %vm244_vm11 = vweird.f32 %v227_v61 }
 0x212   :  { %v230_v63 = vmul.f32 %v1689_v60, %v229_v62 }
 0x214   :  { %v231_v0 = vmul.f32 0.5, %v230_v63 }
 0x216   :  { %v232_v1 = vsub.f32 1.5, %v231_v0 }
 0x217   :  { %v1691_v2 = vpop.eup %1690 }
 0x218   :  { %v233_v3 = vmul.f32 %v1689_v60, %v232_v1  ;;  %v239_v4 = vmul.f32 %v1691_v2, %v227_v61  ;;  %vm245_vm10 = vweird.f32 %v1691_v2 }
 0x219   :  { %vm246_vm12 = vmor %vm244_vm11, %vm245_vm10 }
 0x21a   :  { %v237_v6 = vsel %vm236_vm9, %v1689_v60, %v233_v3  ;;  %v240_v7 = vmul.f32 %v1691_v2, %v239_v4 }
 0x21b   :  { %v248_v9 = vmul.f32 %v237_v6, %v214_v44 }
 0x21c   :  { %v241_v10 = vmul.f32 0.5, %v240_v7 }
 0x21d   :  { %v253_v11 = vmul.f32 %v1684_v5, %v248_v9 }
 0x21e   :  { %v242_v12 = vsub.f32 1.5, %v241_v10 }
 0x21f   :  { %v258_v13 = vadd.f32 %v1685_v8, %v253_v11  }
 0x220   :  { %v243_v14 = vmul.f32 %v1691_v2, %v242_v12 }
 0x222   :  { %v247_v15 = vsel %vm246_vm12, %v1691_v2, %v243_v14 }
 0x223   :  { %v249_v16 = vmul.f32 %v247_v15, %v215_v49 }
 0x225   :  { %v254_v17 = vmul.f32 %v1684_v5, %v249_v16 }
 0x227   :  { %v259_v18 = vadd.f32 %v1685_v8, %v254_v17  }
 0x228 LB: > { %s1609_s2 = sshll.u32 %s1814_s27, 6  ;;  %s2390_s0 = sld [smem:[#allocation13_spill]]  ;;  %v2042_v31 = vpack.c.bf16 %v1806_v18, %v1810_v13  ;;  %vm366_vm13 = vcmask 130048   ;;  %v387_v16 = vperm.slane %v2000_v57, 0  ;;  %vm389_vm14 = vcmask 64512   ;;  %s1814_s27 = sphi %s2013_s27, %s268_s27   ;;  %v1810_v13 = vphi %v258_v13, %v2393_v13   ;;  %v1806_v18 = vphi %v259_v18, %v2392_v18  }
 0x229   : > { %s1448_s30 = sshll.u32 %s1814_s27, 1  ;;  %s1819_s4 = smov 80   ;;  %vm406_vm15 = vcmask 1043456   ;;  %vm612_vm0 = vcmask 392192  }
 0x22a   : > { %s283_s8 = scalar_lea.vmem %s2351_s9, %s1448_s30  ;;  %s1820_s1 = smov 112  }
 0x22b   : > { %v2050_v32 = vld [vmem:[%s283_s8] sm:$0x3]  ;;  %s1821_s5 = smov 64   ;;  %s1822_s26 = smov 32  }
 0x22c   : > { %v287_v33 = vperm.slane %v2050_v32, 0  ;;  %s1823_s28 = smov 16   ;;  %s1824_s6 = smov 48  }
 0x22d   : > { %s1825_s19 = smov 96   ;;  %s1618_s30 = sshll.u32 %s1814_s27, 5 }
 0x22e   : > { %s2030_s7 = scalar_lea.vmem %s2390_s0, %s1609_s2  ;;  %s864_s8 = scalar_lea.vmem %s2352_s10, %s1618_s30 }
 0x22f   : > { %v1475_v19 = vld [vmem:[%s2030_s7 + $0x30] sm:$0xf]  ;;  %v1617_v20 = vld [vmem:[%s2030_s7 + $0x34] sm:$0xf0]  ;;  %v1467_v21 = vld [vmem:[%s2030_s7 + $0x20] sm:$0xf]  ;;  %s924_s29 = scalar_lea.vmem %s2355_s13, %s1814_s27  ;;  %s990_s3 = scalar_lea.vmem %s2357_s15, %s1814_s27 }
 0x230   : > { %v1476_v22 = vor.u32 %v1617_v20, %v1475_v19  ;;  %v1615_v23 = vld [vmem:[%s2030_s7 + $0x24] sm:$0xf0]  ;;  %v1459_v25 = vld [vmem:[%s2030_s7 + $0x10] sm:$0xf]  ;;  %v1613_v26 = vld [vmem:[%s2030_s7 + $0x14] sm:$0xf0] }
 0x231   : > { %v1468_v24 = vor.u32 %v1615_v23, %v1467_v21  ;;  %v1460_v27 = vor.u32 %v1613_v26, %v1459_v25  ;;  %v1451_v28 = vld [vmem:[%s2030_s7] sm:$0xf]  ;;  %v1611_v29 = vld [vmem:[%s2030_s7 + $0x4] sm:$0xf0]  ;;  %v1616_v61 = vld [vmem:[%s2030_s7 + $0x34] sm:$0xf] }
 0x232   : > { %338 = vmatpush.bf16.msra.mxu0 %v1476_v22  ;;  %v1452_v30 = vor.u32 %v1611_v29, %v1451_v28  ;;  %v1477_v62 = vld [vmem:[%s2030_s7 + $0x38] sm:$0xf0]  ;;  %v1614_v0 = vld [vmem:[%s2030_s7 + $0x24] sm:$0xf]  ;;  %v1469_v1 = vld [vmem:[%s2030_s7 + $0x28] sm:$0xf0] }
 0x233   : > { %v1480_v63 = vor.u32 %v1616_v61, %v1477_v62  ;;  %v1472_v2 = vor.u32 %v1614_v0, %v1469_v1  ;;  %v1612_v3 = vld [vmem:[%s2030_s7 + $0x14] sm:$0xf]  ;;  %v1461_v4 = vld [vmem:[%s2030_s7 + $0x18] sm:$0xf0]  ;;  %v1610_v6 = vld [vmem:[%s2030_s7 + $0x4] sm:$0xf] }
 0x234   : > { %v1464_v5 = vor.u32 %v1612_v3, %v1461_v4  ;;  %v1453_v7 = vld [vmem:[%s2030_s7 + $0x8] sm:$0xf0]  ;;  %s873_s7 = scalar_lea.vmem %s2353_s11, %s1814_s27 }
 0x235   : > { %352 = vmatpush.bf16.msra.mxu1 %v1480_v63  ;;  %v1456_v8 = vor.u32 %v1610_v6, %v1453_v7 }
 0x236   : > { %339 = vmatpush.bf16.msra.mxu0 %v1468_v24 }
 0x239   : > { %353 = vmatpush.bf16.msra.mxu1 %v1472_v2 }
 0x23a   : > { %340 = vmatpush.bf16.msra.mxu0 %v1460_v27 }
 0x23d   : > { %354 = vmatpush.bf16.msra.mxu1 %v1464_v5 }
 0x23e   : > { %341 = vmatpush.bf16.msra.mxu0 %v1452_v30  ;;  %v638_v30 = vperm.slane %v2000_v57, 1 }
 0x241   : > { %1481 = vmatmul.msk.bf16.vlgmr.msra.gmra.mxu0 %vm173_vm5, %v2042_v31  ;;  %355 = vmatpush.bf16.msra.mxu1 %v1456_v8 }
 0x244   : > { %1482 = vmatmul.msk.bf16.vlgmr.msra.gmra.mxu1 %vm173_vm5, %v2042_v31 }
 0x2be   : > { %v343_v34 = vpop.f32.mrf.mxu0 }
 0x2bf   : > { %v344_v35 = vadd.f32 %v343_v34, %v287_v33 }
 0x2c1   : > { %v362_v36 = vpack.c.bf16 %v344_v35, %v344_v35 }
 0x2c3   : > { %540 = vrot.lane.b32.xlu2 %v362_v36, %s1819_s4  ;;  %423 = vrot.lane.b32.xlu1 %v362_v36, %s1820_s1 }
 0x2c4   : > { %364 = vrot.lane.b32.xlu0 %v362_v36, %s1821_s5 }
 0x2c6   : > { %v345_v37 = vpop.f32.mrf.mxu0 }
 0x2c7   : > { %v346_v38 = vadd.f32 %v345_v37, %v287_v33 }
 0x2c9   : > { %v614_v39 = vpack.c.bf16 %v346_v38, %v346_v38 }
 0x2cb   : > { %484 = vrot.lane.b32.xlu2 %v362_v36, %s1822_s26  ;;  %542 = vrot.lane.b32.xlu1 %v362_v36, %s1823_s28 }
 0x2cc   : > { %425 = vrot.lane.b32.xlu0 %v362_v36, %s1824_s6 }
 0x2d3   : > { %672 = vrot.lane.b32.xlu2 %v614_v39, %s1820_s1  ;;  %482 = vrot.lane.b32.xlu1 %v362_v36, %s1825_s19 }
 0x2d4   : > { %674 = vrot.lane.b32.xlu0 %v614_v39, %s1824_s6 }
 0x2db   : > { %789 = vrot.lane.b32.xlu2 %v614_v39, %s1819_s4  ;;  %791 = vrot.lane.b32.xlu1 %v614_v39, %s1823_s28 }
 0x2dc   : > { %616 = vrot.lane.b32.xlu0 %v614_v39, %s1821_s5 }
 0x2e3   : > { %731 = vrot.lane.b32.xlu1 %v614_v39, %s1825_s19 }
 0x2e4   : > { %733 = vrot.lane.b32.xlu0 %v614_v39, %s1822_s26 }
 0x31d   : > { %v541_v40 = vpop.permute.xlu2 %540 }
 0x325   : > { %v485_v42 = vpop.permute.xlu2 %484 }
 0x326   : > { %v490_v43 = vsel %vm366_vm13, %v485_v42, 0 }
 0x327   : > { %499 = vmatpush.bf16.xpose.msrb.mxu0 %v490_v43 }
 0x32d   : > { %v673_v9 = vpop.permute.xlu2 %672 }
 0x335   : > { %v424_v44 = vpop.permute.xlu1 %423  ;;  %v790_v11 = vpop.permute.xlu2 %789 }
 0x336   : > { %v365_v45 = vpop.permute.xlu0 %364 }
 0x337   : > { %v371_v46 = vsel %vm366_vm13, %v365_v45, 0 }
 0x338   : > { %380 = vmatpush.bf16.xpose.msra.mxu2 %v371_v46 }
 0x33d   : > { %v543_v47 = vpop.permute.xlu1 %542 }
 0x33e   : > { %v426_v48 = vpop.permute.xlu0 %425  ;;  %v548_v49 = vsel %vm366_vm13, %v543_v47, 0 }
 0x33f   : > { %1483 = vmatmul.msk.bf16.vlgmr.msra.gmra.mxu2 %vm366_vm13, %v362_v36  ;;  %v431_v50 = vsel %vm366_vm13, %v426_v48, 0 }
 0x340   : > { %440 = vmatpush.bf16.xpose.msra.mxu3 %v431_v50 }
 0x345   : > { %v483_v51 = vpop.permute.xlu1 %482 }
 0x346   : > { %v675_v52 = vpop.permute.xlu0 %674  ;;  %1487 = vmatmul.msk.bf16.vlgmr.msrb.gmra.mxu0 %vm366_vm13, %v483_v51 }
 0x347   : > { %v680_v53 = vsel %vm366_vm13, %v675_v52, 0  ;;  %1485 = vmatmul.msk.bf16.vlgmr.msra.gmra.mxu3 %vm366_vm13, %v424_v44 }
 0x348   : > { %557 = vmatpush.bf16.xpose.msrb.mxu3 %v548_v49 }
 0x34d   : > { %v792_v56 = vpop.permute.xlu1 %791 }
 0x34e   : > { %v617_v54 = vpop.permute.xlu0 %616  ;;  %v797_v59 = vsel %vm366_vm13, %v792_v56, 0 }
 0x34f   : > { %v622_v55 = vsel %vm366_vm13, %v617_v54, 0 }
 0x350   : > { %689 = vmatpush.bf16.xpose.msra.mxu3 %v680_v53  ;;  %631 = vmatpush.bf16.xpose.msra.mxu0 %v622_v55 }
 0x355   : > { %v732_v10 = vpop.permute.xlu1 %731 }
 0x356   : > { %v734_v58 = vpop.permute.xlu0 %733 }
 0x357   : > { %v739_v60 = vsel %vm366_vm13, %v734_v58, 0  ;;  %1489 = vmatmul.msk.bf16.vlgmr.msrb.gmra.mxu3 %vm366_vm13, %v541_v40  ;;  %1491 = vmatmul.msk.bf16.vlgmr.msra.gmra.mxu0 %vm366_vm13, %v614_v39 }
 0x358   : > { %806 = vmatpush.bf16.xpose.msrb.mxu3 %v797_v59  ;;  %748 = vmatpush.bf16.xpose.msrb.mxu0 %v739_v60  ;;  %v288_v59 = vperm.slane %v2050_v32, 1  ;;  %v357_v60 = vpop.f32.mrf.mxu1 }
 0x35a   : > { %v358_v61 = vadd.f32 %v357_v60, %v288_v59 }
 0x35c   : > { %v402_v62 = vpack.c.bf16 %v358_v61, %v358_v61 }
 0x35e   : > { %v408_v6 = vsel %vm406_vm15, %v402_v62, 0 }
 0x35f   : > { %417 = vmatpush.bf16.msrb.mxu2 %v408_v6 }
 0x367   : > { %1493 = vmatmul.msk.bf16.vlgmr.msra.gmra.mxu3 %vm366_vm13, %v673_v9  ;;  %1495 = vmatmul.msk.bf16.vlgmr.msrb.gmra.mxu0 %vm366_vm13, %v732_v10 }
 0x377   : > { %1497 = vmatmul.msk.bf16.vlgmr.msrb.gmra.mxu3 %vm366_vm13, %v790_v11  ;;  %v359_v11 = vpop.f32.mrf.mxu1 }
 0x3c2   : > { %v382_v12 = vpop.f32.mrf.mxu2 }
 0x3c3   : > { %v501_v14 = vpop.f32.mrf.mxu0  ;;  %v386_v19 = vmul.f32 0.25, %v382_v12 }
 0x3c4   : > { %v505_v15 = vmul.f32 0.25, %v501_v14 }
 0x3c5   : > { %v388_v25 = vadd.f32 %v387_v16, %v386_v19 }
 0x3c6   : > { %v506_v17 = vadd.f32 %v505_v15, %v387_v16  ;;  %v360_v15 = vadd.f32 %v359_v11, %v288_v59 }
 0x3c7   : > { %v390_v28 = vsel %vm389_vm14, %v388_v25, -inf }
 0x3c8   : > { %v507_v20 = vsel %vm389_vm14, %v506_v17, -inf }
 0x3c9   : > { %508 = vmax.xlane.f32.xlu2 %v507_v20  ;;  %v652_v20 = vpack.c.bf16 %v360_v15, %v360_v15 }
 0x3ca   : > { %v384_v21 = vpop.f32.mrf.mxu2  ;;  %v442_v22 = vpop.f32.mrf.mxu3 }
 0x3cb   : > { %v446_v23 = vmul.f32 0.25, %v442_v22  ;;  %v503_v24 = vpop.f32.mrf.mxu0 }
 0x3cd   : > { %v2093_v26 = vadd.f32 %v446_v23, %v387_v16 }
 0x3cf   : > { %v448_v27 = vsel %vm389_vm14, %v2093_v26, -inf }
 0x3d0   : > { %449 = vmax.xlane.f32.xlu0 %v448_v27 }
 0x3d1   : > { %391 = vmax.xlane.f32.xlu2 %v390_v28 }
 0x3d2   : > { %v444_v29 = vpop.f32.mrf.mxu3 }
 0x3d4   : > { %v633_v31 = vpop.f32.mrf.mxu0 }
 0x3d5   : > { %v637_v33 = vmul.f32 0.25, %v633_v31 }
 0x3d7   : > { %v2099_v34 = vadd.f32 %v638_v30, %v637_v33 }
 0x3d9   : > { %v640_v35 = vsel %vm389_vm14, %v2099_v34, -inf }
 0x3da   : > { %v559_v36 = vpop.f32.mrf.mxu3  ;;  %641 = vmax.xlane.f32.xlu1 %v640_v35 }
 0x3db   : > { %v563_v37 = vmul.f32 0.25, %v559_v36 }
 0x3dc   : > { %v635_v38 = vpop.f32.mrf.mxu0 }
 0x3dd   : > { %v2103_v39 = vadd.f32 %v563_v37, %v387_v16 }
 0x3df   : > { %v565_v40 = vsel %vm389_vm14, %v2103_v39, -inf }
 0x3e2   : > { %v561_v42 = vpop.f32.mrf.mxu3  ;;  %566 = vmax.xlane.f32.xlu1 %v565_v40 }
 0x3e4   : > { %v750_v43 = vpop.f32.mrf.mxu0 }
 0x3e5   : > { %v754_v44 = vmul.f32 0.25, %v750_v43 }
 0x3e7   : > { %v755_v45 = vadd.f32 %v754_v44, %v638_v30 }
 0x3e9   : > { %v756_v46 = vsel %vm389_vm14, %v755_v45, -inf }
 0x3ea   : > { %v691_v47 = vpop.f32.mrf.mxu3  ;;  %757 = vmax.xlane.f32.xlu1 %v756_v46 }
 0x3eb   : > { %v695_v48 = vmul.f32 0.25, %v691_v47 }
 0x3ec   : > { %v752_v49 = vpop.f32.mrf.mxu0 }
 0x3ed   : > { %v696_v50 = vadd.f32 %v695_v48, %v638_v30 }
 0x3ef   : > { %v697_v51 = vsel %vm389_vm14, %v696_v50, -inf }
 0x3f0   : > { %698 = vmax.xlane.f32.xlu2 %v697_v51 }
 0x3f2   : > { %v693_v52 = vpop.f32.mrf.mxu3 }
 0x3fa   : > { %v808_v53 = vpop.f32.mrf.mxu3 }
 0x3fb   : > { %v812_v54 = vmul.f32 0.25, %v808_v53 }
 0x3fd   : > { %v813_v55 = vadd.f32 %v812_v54, %v638_v30 }
 0x3ff   : > { %v814_v56 = vsel %vm389_vm14, %v813_v55, -inf }
 0x400   : > { %815 = vmax.xlane.f32.xlu2 %v814_v56 }
 0x402   : > { %v810_v58 = vpop.f32.mrf.mxu3 }
 0x403   : > { %v657_v58 = vsel %vm406_vm15, %v652_v20, 0 }
 0x418   : > { %461 = vrot.lane.b32.xlu2 %v402_v62, %s1820_s1 }
 0x43c   : > { %v509_v63 = vpop.xlane.xlu2 %508 }
 0x43d   : > { %v510_v0 = vsub.f32 %v506_v17, %v509_v63 }
 0x43f   : > { %v511_v1 = vmul.f32 1.442695, %v510_v0 }
 0x441   : > { %1714 = vpow2.f32 %v511_v1 }
 0x443   : > { %v450_v27 = vpop.xlane.xlu0 %449 }
 0x444   : > { %v392_v2 = vpop.xlane.xlu2 %391  ;;  %v451_v28 = vsub.f32 %v2093_v26, %v450_v27 }
 0x445   : > { %v393_v3 = vsub.f32 %v388_v25, %v392_v2 }
 0x446   : > { %v452_v30 = vmul.f32 1.442695, %v451_v28 }
 0x447   : > { %v2112_v4 = vpop.eup %1714  ;;  %v394_v5 = vmul.f32 1.442695, %v393_v3 }
 0x448   : > { %v513_v32 = vsel %vm389_vm14, %v2112_v4, 0.0 }
 0x449   : > { %1716 = vpow2.f32 %v394_v5  ;;  %514 = vadd.xlane.f32.xlu1 %v513_v32 }
 0x44d   : > { %v642_v8 = vpop.xlane.xlu1 %641 }
 0x44e   : > { %v643_v33 = vsub.f32 %v2099_v34, %v642_v8 }
 0x44f   : > { %v1717_v7 = vpop.eup %1716 }
 0x450   : > { %v396_v9 = vsel %vm389_vm14, %v1717_v7, 0.0  ;;  %v644_v36 = vmul.f32 1.442695, %v643_v33 }
 0x451   : > { %397 = vadd.xlane.f32.xlu0 %v396_v9 }
 0x455   : > { %v567_v10 = vpop.xlane.xlu1 %566 }
 0x456   : > { %v568_v38 = vsub.f32 %v2103_v39, %v567_v10 }
 0x458   : > { %v569_v26 = vmul.f32 1.442695, %v568_v38 }
 0x45d   : > { %v758_v12 = vpop.xlane.xlu1 %757 }
 0x45e   : > { %v759_v17 = vsub.f32 %v755_v45, %v758_v12 }
 0x460   : > { %v760_v21 = vmul.f32 1.442695, %v759_v17 }
 0x462   : > { %519 = vrot.lane.b32.xlu1 %v402_v62, %s1825_s19 }
 0x463   : > { %v699_v14 = vpop.xlane.xlu2 %698 }
 0x464   : > { %v700_v16 = vsub.f32 %v696_v50, %v699_v14 }
 0x465   : > { %577 = vrot.lane.b32.xlu0 %v402_v62, %s1819_s4 }
 0x466   : > { %v701_v19 = vmul.f32 1.442695, %v700_v16 }
 0x468   : > { %1718 = vpow2.f32 %v701_v19 }
 0x469   : > { %1720 = vpow2.f32 %v760_v21 }
 0x46a   : > { %710 = vrot.lane.b32.xlu1 %v652_v20, %s1820_s1  ;;  %1722 = vpow2.f32 %v452_v30  ;;  %s1205_s1 = scalar_lea.vmem %s2360_s18, %s1814_s27 }
 0x46e   : > { %v2121_v22 = vpop.eup %1718 }
 0x46f   : > { %v703_v23 = vsel %vm389_vm14, %v2121_v22, 0.0  ;;  %v2125_v24 = vpop.eup %1720 }
 0x470   : > { %704 = vadd.xlane.f32.xlu2 %v703_v23  ;;  %v762_v25 = vsel %vm389_vm14, %v2125_v24, 0.0  ;;  %v1723_v37 = vpop.eup %1722 }
 0x471   : > { %v454_v40 = vsel %vm389_vm14, %v1723_v37, 0.0 }
 0x473   : > { %v816_v29 = vpop.xlane.xlu2 %815 }
 0x474   : > { %v817_v31 = vsub.f32 %v813_v55, %v816_v29 }
 0x476   : > { %v818_v35 = vmul.f32 1.442695, %v817_v31 }
 0x478   : > { %763 = vadd.xlane.f32.xlu2 %v762_v25  ;;  %1724 = vpow2.f32 %v818_v35 }
 0x479   : > { %1726 = vpow2.f32 %v644_v36 }
 0x47a   : > { %1728 = vpow2.f32 %v569_v26 }
 0x47b   : > { %v462_v46 = vpop.permute.xlu2 %461 }
 0x47c   : > { %v467_v47 = vsel %vm406_vm15, %v462_v46, 0 }
 0x47d   : > { %476 = vmatpush.bf16.msra.mxu2 %v467_v47 }
 0x47e   : > { %v2133_v42 = vpop.eup %1724 }
 0x47f   : > { %v1727_v43 = vpop.eup %1726  ;;  %v820_v44 = vsel %vm389_vm14, %v2133_v42, 0.0 }
 0x480   : > { %v646_v34 = vsel %vm389_vm14, %v1727_v43, 0.0  ;;  %v1729_v45 = vpop.eup %1728 }
 0x481   : > { %v571_v39 = vsel %vm389_vm14, %v1729_v45, 0.0 }
 0x48f   : > { %455 = vadd.xlane.f32.xlu0 %v454_v40 }
 0x490   : > { %768 = vrot.lane.b32.xlu2 %v652_v20, %s1825_s19  ;;  %s1135_s19 = scalar_lea.vmem %s2359_s17, %s1814_s27 }
 0x494   : > { %821 = vadd.xlane.f32.xlu1 %v820_v44 }
 0x497   : > { %647 = vadd.xlane.f32.xlu0 %v646_v34 }
 0x49f   : > { %572 = vadd.xlane.f32.xlu0 %v571_v39 }
 0x4b3   : > { %826 = vrot.lane.b32.xlu0 %v652_v20, %s1819_s4  ;;  %s981_s4 = scalar_lea.vmem %s2356_s14, %s1618_s30 }
 0x4bc   : > { %v515_v49 = vpop.xlane.xlu1 %514 }
 0x4c4   : > { %v398_v48 = vpop.xlane.xlu0 %397 }
 0x4c5   : > { %1730 = vrcp.f32 %v398_v48 }
 0x4c6   : > { %1732 = vrcp.f32 %v515_v49 }
 0x4cb   : > { %v1731_v50 = vpop.eup %1730 }
 0x4cc   : > { %v400_v51 = vmul.f32 %v1731_v50, %v1717_v7  ;;  %v1733_v53 = vpop.eup %1732  ;;  %v1622_v50 = vld [vmem:[%s864_s8 + $0x18] sm:$0xff] }
 0x4cd   : > { %v517_v54 = vmul.f32 %v1733_v53, %v2112_v4  ;;  %910 = vmatpush.bf16.msra.mxu0 %v1622_v50  ;;  %v1619_v53 = vld [vmem:[%s864_s8] sm:$0xff] }
 0x4ce   : > { %v401_v52 = vpack.c.bf16 %v400_v51, %v400_v51  ;;  %v1621_v51 = vld [vmem:[%s864_s8 + $0x10] sm:$0xff] }
 0x4cf   : > { %v518_v60 = vpack.c.bf16 %v517_v54, %v517_v54 }
 0x4d0   : > { %1484 = vmatmul.msk.bf16.vlgmr.msrb.gmra.mxu2 %vm389_vm14, %v401_v52  ;;  %v1620_v52 = vld [vmem:[%s864_s8 + $0x8] sm:$0xff]  ;;  %s2241_s8 = scalar_lea.vmem %s2358_s16, %s1609_s2 }
 0x4d1   : > { %911 = vmatpush.bf16.msra.mxu0 %v1621_v51 }
 0x4d4   : > { %v520_v55 = vpop.permute.xlu1 %519 }
 0x4d5   : > { %v525_v56 = vsel %vm406_vm15, %v520_v55, 0  ;;  %912 = vmatpush.bf16.msra.mxu0 %v1620_v52 }
 0x4d6   : > { %534 = vmatpush.bf16.msrb.mxu1 %v525_v56 }
 0x4d7   : > { %v578_v59 = vpop.permute.xlu0 %577 }
 0x4d8   : > { %v583_v61 = vsel %vm406_vm15, %v578_v59, 0 }
 0x4d9   : > { %1488 = vmatmul.msk.bf16.vlgmr.msrb.gmra.mxu1 %vm389_vm14, %v518_v60  ;;  %592 = vmatpush.bf16.msrb.mxu2 %v583_v61 }
 0x4da   : > { %666 = vmatpush.bf16.msra.mxu1 %v657_v58  ;;  %913 = vmatpush.bf16.msra.mxu0 %v1619_v53 }
 0x4dc   : > { %v711_v6 = vpop.permute.xlu1 %710 }
 0x4dd   : > { %v716_v7 = vsel %vm406_vm15, %v711_v6, 0 }
 0x4e3   : > { %v705_v62 = vpop.xlane.xlu2 %704 }
 0x4eb   : > { %v764_v63 = vpop.xlane.xlu2 %763 }
 0x4f3   : > { %v769_v0 = vpop.permute.xlu2 %768 }
 0x4f4   : > { %v774_v1 = vsel %vm406_vm15, %v769_v0, 0 }
 0x4f5   : > { %783 = vmatpush.bf16.msrb.mxu1 %v774_v1 }
 0x502   : > { %v456_v2 = vpop.xlane.xlu0 %455 }
 0x503   : > { %1734 = vrcp.f32 %v456_v2 }
 0x507   : > { %v822_v28 = vpop.xlane.xlu1 %821 }
 0x509   : > { %v1735_v3 = vpop.eup %1734 }
 0x50a   : > { %v458_v4 = vmul.f32 %v1735_v3, %v1723_v37  ;;  %v648_v5 = vpop.xlane.xlu0 %647 }
 0x50b   : > { %1736 = vrcp.f32 %v648_v5 }
 0x50c   : > { %v459_v32 = vpack.c.bf16 %v458_v4, %v458_v4 }
 0x50e   : > { %1486 = vmatmul.msk.bf16.vlgmr.msra.gmra.mxu2 %vm389_vm14, %v459_v32  ;;  %v1707_v32 = vld [vmem:[%s873_s7] ss:$0 sm:$0xff] }
 0x50f   : > { %725 = vmatpush.bf16.msra.mxu2 %v716_v7 }
 0x511   : > { %v1737_v8 = vpop.eup %1736 }
 0x512   : > { %v650_v9 = vmul.f32 %v1737_v8, %v1727_v43  ;;  %v573_v10 = vpop.xlane.xlu0 %572 }
 0x513   : > { %1738 = vrcp.f32 %v573_v10 }
 0x514   : > { %v651_v11 = vpack.c.bf16 %v650_v9, %v650_v9  ;;  %1740 = vrcp.f32 %v764_v63 }
 0x515   : > { %1742 = vrcp.f32 %v705_v62 }
 0x516   : > { %1492 = vmatmul.msk.bf16.vlgmr.msra.gmra.mxu1 %vm389_vm14, %v651_v11  ;;  %1744 = vrcp.f32 %v822_v28  ;;  %v1627_v28 = vld [vmem:[%s981_s4 + $0x18] sm:$0xff] }
 0x517   : > { %1027 = vmatpush.bf16.msra.mxu1 %v1627_v28 }
 0x519   : > { %v1739_v12 = vpop.eup %1738 }
 0x51a   : > { %v575_v14 = vmul.f32 %v1739_v12, %v1729_v45  ;;  %v1741_v16 = vpop.eup %1740 }
 0x51b   : > { %v766_v17 = vmul.f32 %v1741_v16, %v2125_v24  ;;  %v1743_v20 = vpop.eup %1742 }
 0x51c   : > { %v576_v15 = vpack.c.bf16 %v575_v14, %v575_v14  ;;  %v707_v25 = vmul.f32 %v1743_v20, %v2121_v22  ;;  %v1745_v29 = vpop.eup %1744 }
 0x51d   : > { %v767_v19 = vpack.c.bf16 %v766_v17, %v766_v17  ;;  %v824_v30 = vmul.f32 %v1745_v29, %v2133_v42  ;;  %v1626_v29 = vld [vmem:[%s981_s4 + $0x10] sm:$0xff] }
 0x51e   : > { %1490 = vmatmul.msk.bf16.vlgmr.msrb.gmra.mxu2 %vm389_vm14, %v576_v15  ;;  %v708_v27 = vpack.c.bf16 %v707_v25, %v707_v25  ;;  %1028 = vmatpush.bf16.msra.mxu1 %v1626_v29 }
 0x51f   : > { %v825_v31 = vpack.c.bf16 %v824_v30, %v824_v30  ;;  %v1625_v30 = vld [vmem:[%s981_s4 + $0x8] sm:$0xff] }
 0x522   : > { %1029 = vmatpush.bf16.msra.mxu1 %v1625_v30  ;;  %v1630_v30 = vld [vmem:[%s2241_s8 + $0x8] sm:$0xff] }
 0x525   : > { %v827_v21 = vpop.permute.xlu0 %826 }
 0x526   : > { %v832_v23 = vsel %vm406_vm15, %v827_v21, 0  ;;  %1496 = vmatmul.msk.bf16.vlgmr.msrb.gmra.mxu1 %vm389_vm14, %v767_v19 }
 0x527   : > { %841 = vmatpush.bf16.msrb.mxu2 %v832_v23 }
 0x52e   : > { %1494 = vmatmul.msk.bf16.vlgmr.msra.gmra.mxu2 %vm389_vm14, %v708_v27 }
 0x53e   : > { %1498 = vmatmul.msk.bf16.vlgmr.msrb.gmra.mxu2 %vm389_vm14, %v825_v31 }
 0x553   : > { %v419_v24 = vpop.f32.mrf.mxu2 }
 0x556   : > { %v536_v33 = vpop.f32.mrf.mxu1 }
 0x55b   : > { %v421_v35 = vpop.f32.mrf.mxu2 }
 0x55e   : > { %v538_v36 = vpop.f32.mrf.mxu1 }
 0x591   : > { %v478_v37 = vpop.f32.mrf.mxu2 }
 0x593   : > { %v668_v38 = vpop.f32.mrf.mxu1 }
 0x599   : > { %v480_v40 = vpop.f32.mrf.mxu2 }
 0x59b   : > { %v670_v22 = vpop.f32.mrf.mxu1 }
 0x5a1   : > { %v594_v26 = vpop.f32.mrf.mxu2 }
 0x5a3   : > { %v785_v43 = vpop.f32.mrf.mxu1 }
 0x5a4   : > { %v1697_v44 = vpack.i.bf16 %v785_v43, %v536_v33  ;;  %v1624_v33 = vld [vmem:[%s981_s4] sm:$0xff] }
 0x5a5   : > { %1030 = vmatpush.bf16.msra.mxu1 %v1624_v33 }
 0x5a6   : > { %1698 = vrot.lane.b32.xlu0 %v1697_v44, %s1822_s26 }
 0x5a9   : > { %v596_v42 = vpop.f32.mrf.mxu2 }
 0x5ab   : > { %v787_v34 = vpop.f32.mrf.mxu1 }
 0x5b1   : > { %v727_v45 = vpop.f32.mrf.mxu2 }
 0x5b2   : > { %v1692_v39 = vpack.i.bf16 %v727_v45, %v478_v37 }
 0x5b4   : > { %1693 = vrot.lane.b32.xlu1 %v1692_v39, %s1823_s28  ;;  %s922_s28 = scalar_lea.vmem %s2354_s12, %s1814_s27 }
 0x5b5   : > { %v1708_v50 = vld [vmem:[%s922_s28] ss:$0 sm:$0xff]  ;;  %s2391_s28 = sld [smem:[#allocation14_spill]] }
 0x5b9   : > { %v729_v46 = vpop.f32.mrf.mxu2 }
 0x5c1   : > { %v843_v47 = vpop.f32.mrf.mxu2 }
 0x5c2   : > { %v1702_v48 = vpack.i.bf16 %v843_v47, %v594_v26 }
 0x5c4   : > { %1703 = vrot.lane.b32.xlu2 %v1702_v48, %s1824_s6  ;;  %s1207_s6 = scalar_lea.vmem %s2391_s28, %s1814_s27  ;;  %s268_s27 = sadd.s32 1, %s1814_s27  }
 0x5c5   : > { %p265_p0 = scmp.ge.s32.totalorder %s268_s27, 2  }
 0x5c6   :  { %s1827_s26 = smov (%p265_p0), [#allocation2]  }
 0x5c7   :  { %s1381_s28 = sshll.u32 (%p265_p0), %s1827_s26, 4  ;;  %s1382_s28 = int_to_ptr.vmem [resolvable:$true] %s1381_s28 }
 0x5c9   : > { %v845_v49 = vpop.f32.mrf.mxu2 }
 0x618   : > { %v1699_v54 = vpop.permute.xlu0 %1698 }
 0x619   : > { %v1701_v60 = vunpack.i.h.bf16 %v1699_v54  ;;  %v1700_v61 = vunpack.i.l.bf16 %v1699_v54 }
 0x61e   : > { %v1704_v55 = vpop.permute.xlu2 %1703 }
 0x61f   : > { %v1706_v62 = vunpack.i.h.bf16 %v1704_v55  ;;  %v1705_v63 = vunpack.i.l.bf16 %v1704_v55  ;;  %v1709_v55 = vld [vmem:[%s924_s29] ss:$0 sm:$0xff] }
 0x626   : > { %v1694_v56 = vpop.permute.xlu1 %1693 }
 0x627   : > { %v1696_v58 = vunpack.i.h.bf16 %v1694_v56  ;;  %v1695_v59 = vunpack.i.l.bf16 %v1694_v56 }
 0x629   : > { %v859_v0 = vsel %vm366_vm13, %v668_v38, %v1696_v58  ;;  %v610_v1 = vsel %vm366_vm13, %v419_v24, %v1695_v59 }
 0x62a   : > { %v611_v2 = vsel %vm131_vm4, %v610_v1, %v1700_v61  ;;  %v860_v3 = vsel %vm131_vm4, %v859_v0, %v1701_v60  ;;  %v1710_v61 = vld [vmem:[%s990_s3] ss:$0 sm:$0xff]  ;;  %v1636_v1 = vld [vmem:[%s2241_s8 + $0x38] sm:$0xff]  ;;  %vm1266_vm4 = vcmask (%p265_p0), 1040384  }
 0x62b   : > { %v613_v4 = vsel %vm612_vm0, %v611_v2, %v1705_v63  ;;  %v861_v5 = vsel %vm612_vm0, %v860_v3, %v1706_v62  ;;  %1189 = vmatpush.bf16.msra.mxu3 %v1636_v1 }
 0x62c   : > { %v875_v6 = vpack.c.bf16 %v861_v5, %v613_v4  ;;  %v1635_v4 = vld [vmem:[%s2241_s8 + $0x30] sm:$0xff] }
 0x62e   : > { %1517 = vmatmul.msk.bf16.vlgmr.msra.gmra.mxu0 %vm173_vm5, %v875_v6 }
 0x62f   : > { %1190 = vmatpush.bf16.msra.mxu3 %v1635_v4 }
 0x6ab   : > { %v915_v7 = vpop.f32.mrf.mxu0 }
 0x6ac   : > { %v916_v8 = vadd.f32 %v1707_v32, %v915_v7  ;;  %v1634_v7 = vld [vmem:[%s2241_s8 + $0x28] sm:$0xff] }
 0x6ad   : > { %1191 = vmatpush.bf16.msra.mxu3 %v1634_v7 }
 0x6ae   : > { %v920_v9 = vadd.f32 %v1810_v13, %v916_v8 }
 0x6b0   : > { %v926_v10 = vsel %vm173_vm5, %v920_v9, 0.0 }
 0x6b1   : > { %927 = vadd.xlane.f32.xlu0 %v926_v10  ;;  %v1633_v10 = vld [vmem:[%s2241_s8 + $0x20] sm:$0xff] }
 0x6b2   : > { %1192 = vmatpush.bf16.msra.mxu3 %v1633_v10  ;;  %v1826_v10 = vmov -1.0  }
 0x6b3   : > { %v917_v11 = vpop.f32.mrf.mxu0 }
 0x6b4   : > { %v918_v12 = vadd.f32 %v1707_v32, %v917_v11 }
 0x6b6   : > { %v921_v14 = vadd.f32 %v1806_v18, %v918_v12 }
 0x6b8   : > { %v929_v15 = vsel %vm173_vm5, %v921_v14, 0.0 }
 0x6b9   : > { %930 = vadd.xlane.f32.xlu2 %v929_v15 }
 0x724   : > { %v928_v16 = vpop.xlane.xlu0 %927 }
 0x725   : > { %v932_v17 = vmul.f32 %v928_v16, %v1990_v41  ;;  %v1632_v16 = vld [vmem:[%s2241_s8 + $0x18] sm:$0xff] }
 0x726   : > { %1193 = vmatpush.bf16.msra.mxu3 %v1632_v16 }
 0x727   : > { %v934_v19 = vsub.f32 %v920_v9, %v932_v17 }
 0x729   : > { %v936_v20 = vmul.f32 %v934_v19, %v934_v19 }
 0x72b   : > { %v938_v13 = vsel %vm173_vm5, %v936_v20, 0.0 }
 0x72c   : > { %v931_v21 = vpop.xlane.xlu2 %930  ;;  %939 = vadd.xlane.f32.xlu1 %v938_v13 }
 0x72d   : > { %v933_v23 = vmul.f32 %v931_v21, %v1990_v41  ;;  %v1631_v21 = vld [vmem:[%s2241_s8 + $0x10] sm:$0xff] }
 0x72e   : > { %1194 = vmatpush.bf16.msra.mxu3 %v1631_v21 }
 0x72f   : > { %v935_v25 = vsub.f32 %v921_v14, %v933_v23 }
 0x731   : > { %v937_v27 = vmul.f32 %v935_v25, %v935_v25 }
 0x732   : > { %1195 = vmatpush.bf16.msra.mxu3 %v1630_v30 }
 0x733   : > { %v941_v18 = vsel %vm173_vm5, %v937_v27, 0.0 }
 0x734   : > { %942 = vadd.xlane.f32.xlu0 %v941_v18 }
 0x79f   : > { %v940_v31 = vpop.xlane.xlu1 %939 }
 0x7a0   : > { %v944_v24 = vmul.f32 %v940_v31, %v1990_v41 }
 0x7a2   : > { %v946_v35 = vadd.f32 1e-05, %v944_v24 }
 0x7a4   : > { %1746 = vrsqrt.f32 %v946_v35  ;;  %vm954_vm2 = vweird.f32 %v946_v35 }
 0x7a7   : > { %v943_v36 = vpop.xlane.xlu0 %942 }
 0x7a8   : > { %v945_v37 = vmul.f32 %v943_v36, %v1990_v41 }
 0x7aa   : > { %v1747_v38 = vpop.eup %1746  ;;  %v947_v40 = vadd.f32 1e-05, %v945_v37 }
 0x7ab   : > { %v949_v22 = vmul.f32 %v1747_v38, %v946_v35  ;;  %vm955_vm1 = vweird.f32 %v1747_v38 }
 0x7ac   : > { %1748 = vrsqrt.f32 %v947_v40  ;;  %vm956_vm3 = vmor %vm954_vm2, %vm955_vm1  ;;  %vm964_vm7 = vweird.f32 %v947_v40 }
 0x7ad   : > { %v950_v26 = vmul.f32 %v1747_v38, %v949_v22 }
 0x7af   : > { %v951_v43 = vmul.f32 0.5, %v950_v26 }
 0x7b1   : > { %v952_v44 = vsub.f32 1.5, %v951_v43 }
 0x7b2   : > { %v1749_v42 = vpop.eup %1748 }
 0x7b3   : > { %v953_v34 = vmul.f32 %v1747_v38, %v952_v44  ;;  %v959_v45 = vmul.f32 %v1749_v42, %v947_v40  ;;  %vm965_vm6 = vweird.f32 %v1749_v42  ;;  %v1629_v40 = vld [vmem:[%s2241_s8] sm:$0xff] }
 0x7b4   : > { %vm966_vm8 = vmor %vm964_vm7, %vm965_vm6  ;;  %1196 = vmatpush.bf16.msra.mxu3 %v1629_v40 }
 0x7b5   : > { %v960_v39 = vmul.f32 %v1749_v42, %v959_v45  ;;  %v957_v46 = vsel %vm956_vm3, %v1747_v38, %v953_v34 }
 0x7b6   : > { %v968_v49 = vmul.f32 %v957_v46, %v934_v19 }
 0x7b7   : > { %v961_v47 = vmul.f32 0.5, %v960_v39 }
 0x7b8   : > { %v973_v54 = vmul.f32 %v1708_v50, %v968_v49 }
 0x7b9   : > { %v962_v48 = vsub.f32 1.5, %v961_v47 }
 0x7ba   : > { %v2220_v58 = vadd.f32 %v1709_v55, %v973_v54 }
 0x7bb   : > { %v963_v51 = vmul.f32 %v1749_v42, %v962_v48 }
 0x7bd   : > { %v967_v52 = vsel %vm966_vm8, %v1749_v42, %v963_v51 }
 0x7be   : > { %v969_v53 = vmul.f32 %v967_v52, %v935_v25 }
 0x7c0   : > { %v974_v56 = vmul.f32 %v1708_v50, %v969_v53 }
 0x7c2   : > { %v2222_v59 = vadd.f32 %v1709_v55, %v974_v56 }
 0x7c4   : > { %v992_v60 = vpack.c.bf16 %v2222_v59, %v2220_v58 }
 0x7c6   : > { %1535 = vmatmul.msk.bf16.vlgmr.msra.gmra.mxu1 %vm173_vm5, %v992_v60 }
 0x843   : > { %v1032_v62 = vpop.f32.mrf.mxu1 }
 0x844   : > { %v2243_v63 = vadd.f32 %v1710_v61, %v1032_v62 }
 0x846   : > { %v2246_v0 = vmul.f32 0.70710677, %v2243_v63 }
 0x848   : > { %v1045_v2 = vand.u32 2147483647, %v2246_v0  ;;  %vm1041_vm1 = vcmp.ge.f32.partialorder %v2246_v0, 0.0 }
 0x84a   : > { %v1047_v3 = vmul.f32 0.3275911, %v1045_v2  ;;  %v1099_v24 = vsub.f32 0.0, %v1045_v2 }
 0x84b   : > { %v1034_v5 = vpop.f32.mrf.mxu1 }
 0x84c   : > { %v1049_v6 = vadd.f32 1.0, %v1047_v3  ;;  %v2251_v32 = vadd.f32 %v1710_v61, %v1034_v5  ;;  %v1101_v26 = vmul.f32 %v1099_v24, %v1045_v2 }
 0x84e   : > { %1750 = vrcp.f32 %v1049_v6  ;;  %v2255_v8 = vmul.f32 0.70710677, %v2251_v32  ;;  %v1062_v19 = vand.u32 2147483648, %v1049_v6  ;;  %v1060_v13 = vand.u32 2147483647, %v1049_v6 }
 0x84f   : > { %vm1056_vm10 = vweird.f32 %v1049_v6  ;;  %v1103_v39 = vmul.f32 1.442695, %v1101_v26  ;;  %v1038_v0 = vmul.f32 0.5, %v2251_v32 }
 0x850   : > { %v1046_v9 = vand.u32 2147483647, %v2255_v8  ;;  %v1063_v25 = vor.u32 1.1754944e-38, %v1062_v19  ;;  %vm1061_vm12 = vcmp.eq.f32.partialorder %v1060_v13, 8.507059e+37  ;;  %vm1042_vm2 = vcmp.ge.f32.partialorder %v2255_v8, 0.0 }
 0x851   : > { %v1037_v19 = vmul.f32 0.5, %v2243_v63  ;;  %v1711_v8 = vld [vmem:[%s1135_s19] ss:$0 sm:$0xff]  ;;  %s1383_s19 = sshll.u32 (%p265_p0), %s2366_s24, 4  ;;  %s1384_s19 = int_to_ptr.hbm [resolvable:$true] %s1383_s19 }
 0x852   : > { %v1048_v11 = vmul.f32 0.3275911, %v1046_v9  ;;  %v1100_v47 = vsub.f32 0.0, %v1046_v9 }
 0x854   : > { %v1751_v12 = vpop.eup %1750  ;;  %v1050_v15 = vadd.f32 1.0, %v1048_v11  ;;  %v1102_v52 = vmul.f32 %v1100_v47, %v1046_v9  ;;  %v1043_v9 = vsel %vm1041_vm1, 1.0, %v1826_v10 }
 0x855   : > { %v1052_v14 = vmul.f32 %v1751_v12, %v1049_v6  ;;  %vm1057_vm9 = vweird.f32 %v1751_v12 }
 0x856   : > { %1752 = vrcp.f32 %v1050_v15  ;;  %vm1058_vm11 = vmor %vm1056_vm10, %vm1057_vm9  ;;  %v1077_v36 = vand.u32 2147483648, %v1050_v15  ;;  %v1075_v38 = vand.u32 2147483647, %v1050_v15  ;;  %vm1071_vm14 = vweird.f32 %v1050_v15 }
 0x857   : > { %v1053_v17 = vsub.f32 1.0, %v1052_v14  ;;  %1754 = vpow2.f32 %v1103_v39  ;;  %v1105_v60 = vmul.f32 1.442695, %v1102_v52  ;;  %v1712_v52 = vld [vmem:[%s1205_s1] ss:$0 sm:$0xff] }
 0x858   : > { %v1078_v42 = vor.u32 1.1754944e-38, %v1077_v36  ;;  %vm1076_vm0 = vcmp.eq.f32.partialorder %v1075_v38, 8.507059e+37 }
 0x859   : > { %v1054_v20 = vmul.f32 %v1751_v12, %v1053_v17  ;;  %1756 = vpow2.f32 %v1105_v60 }
 0x85b   : > { %v1055_v23 = vadd.f32 %v1751_v12, %v1054_v20 }
 0x85c   : > { %v1753_v27 = vpop.eup %1752 }
 0x85d   : > { %v1059_v18 = vsel %vm1058_vm11, %v1751_v12, %v1055_v23  ;;  %v1067_v29 = vmul.f32 %v1753_v27, %v1050_v15  ;;  %vm1072_vm13 = vweird.f32 %v1753_v27  ;;  %v1755_v62 = vpop.eup %1754  ;;  %v1044_v15 = vsel %vm1042_vm2, 1.0, %v1826_v10  ;;  %v1644_v10 = vld [vmem:[%s2364_s22 + $0x18] sm:$0xff] (%p265_p0) }
 0x85e   : > { %v1064_v28 = vsel %vm1061_vm12, %v1063_v25, %v1059_v18  ;;  %vm1073_vm15 = vmor %vm1071_vm14, %vm1072_vm13  ;;  %1366 = vmatpush.bf16.msra.mxu1 (%p265_p0), %v1644_v10 }
 0x85f   : > { %v1081_v31 = vmul.f32 1.0614054, %v1064_v28  ;;  %v1068_v33 = vsub.f32 1.0, %v1067_v29  ;;  %v1757_v7 = vpop.eup %1756 }
 0x861   : > { %v1083_v35 = vadd.f32 -1.4531521, %v1081_v31  ;;  %v1069_v37 = vmul.f32 %v1753_v27, %v1068_v33 }
 0x863   : > { %v1085_v22 = vmul.f32 %v1083_v35, %v1064_v28  ;;  %v1070_v43 = vadd.f32 %v1753_v27, %v1069_v37 }
 0x865   : > { %v1087_v44 = vadd.f32 1.4214138, %v1085_v22  ;;  %v1074_v34 = vsel %vm1073_vm15, %v1753_v27, %v1070_v43 }
 0x866   : > { %v1079_v46 = vsel %vm1076_vm0, %v1078_v42, %v1074_v34 }
 0x867   : > { %v1089_v45 = vmul.f32 %v1087_v44, %v1064_v28  ;;  %v1082_v48 = vmul.f32 1.0614054, %v1079_v46 }
 0x869   : > { %v1091_v49 = vadd.f32 -0.28449672, %v1089_v45  ;;  %v1084_v50 = vadd.f32 -1.4531521, %v1082_v48 }
 0x86b   : > { %v1093_v51 = vmul.f32 %v1091_v49, %v1064_v28  ;;  %v1086_v53 = vmul.f32 %v1084_v50, %v1079_v46 }
 0x86d   : > { %v1095_v54 = vadd.f32 0.2548296, %v1093_v51  ;;  %v1088_v55 = vadd.f32 1.4214138, %v1086_v53 }
 0x86f   : > { %v1097_v56 = vmul.f32 %v1095_v54, %v1064_v28  ;;  %v1090_v61 = vmul.f32 %v1088_v55, %v1079_v46  ;;  %v1713_v55 = vld [vmem:[%s1207_s6] ss:$0 sm:$0xff] }
 0x871   : > { %v1107_v1 = vmul.f32 %v1755_v62, %v1097_v56  ;;  %v1092_v2 = vadd.f32 -0.28449672, %v1090_v61 }
 0x873   : > { %v1094_v3 = vmul.f32 %v1092_v2, %v1079_v46  ;;  %v1109_v4 = vsub.f32 1.0, %v1107_v1 }
 0x875   : > { %v1096_v5 = vadd.f32 0.2548296, %v1094_v3  ;;  %v1111_v11 = vmul.f32 %v1109_v4, %v1043_v9  ;;  %v1639_v9 = vld [vmem:[%s2362_s20 + $0x10] sm:$0xff] (%p265_p0) }
 0x877   : > { %v1098_v6 = vmul.f32 %v1096_v5, %v1079_v46  ;;  %v1113_v16 = vadd.f32 1.0, %v1111_v11  ;;  %v1638_v11 = vld [vmem:[%s2362_s20 + $0x8] sm:$0xff] (%p265_p0) }
 0x879   : > { %v1108_v12 = vmul.f32 %v1757_v7, %v1098_v6  ;;  %v1115_v13 = vmul.f32 %v1113_v16, %v1037_v19  ;;  %v1640_v7 = vld [vmem:[%s2362_s20 + $0x18] sm:$0xff] (%p265_p0)  ;;  %v1642_v16 = vld [vmem:[%s2364_s22 + $0x8] sm:$0xff] (%p265_p0)  ;;  %v1762_v19 = vld [vmem:[%s2363_s21] ss:$0 sm:$0xff] (%p265_p0) }
 0x87a   :  { %1312 = vmatpush.bf16.msra.mxu0 (%p265_p0), %v1640_v7 }
 0x87b   : > { %v1110_v14 = vsub.f32 1.0, %v1108_v12 }
 0x87d   : > { %v1112_v17 = vmul.f32 %v1110_v14, %v1044_v15  ;;  %v1643_v15 = vld [vmem:[%s2364_s22 + $0x10] sm:$0xff] (%p265_p0) }
 0x87e   :  { %1313 = vmatpush.bf16.msra.mxu0 (%p265_p0), %v1639_v9  ;;  %1367 = vmatpush.bf16.msra.mxu1 (%p265_p0), %v1643_v15 }
 0x87f   : > { %v1114_v20 = vadd.f32 1.0, %v1112_v17  ;;  %v1641_v17 = vld [vmem:[%s2364_s22] sm:$0xff] (%p265_p0) }
 0x881   : > { %v1116_v21 = vmul.f32 %v1114_v20, %v1038_v0 }
 0x882   :  { %1314 = vmatpush.bf16.msra.mxu0 (%p265_p0), %v1638_v11  ;;  %1368 = vmatpush.bf16.msra.mxu1 (%p265_p0), %v1642_v16 }
 0x883   : > { %v1137_v23 = vpack.c.bf16 %v1116_v21, %v1115_v13 }
 0x885   : > { %1197 = vmatmul.bf16.vlgmr.msra.gmra.mxu3 %v1137_v23 }
 0x886   :  { %1369 = vmatpush.bf16.msra.mxu1 (%p265_p0), %v1641_v17 }
 0x908   : > { %v1198_v25 = vpop.f32.mrf.mxu3 }
 0x909   : > { %v1199_v27 = vadd.f32 %v1711_v8, %v1198_v25 }
 0x90b   : > { %v1203_v18 = vadd.f32 %v1199_v27, %v2220_v58 }
 0x90d   : > { %v1209_v28 = vsel %vm173_vm5, %v1203_v18, 0.0 }
 0x90e   : > { %1210 = vadd.xlane.f32.xlu2 %v1209_v28 }
 0x910   : > { %v1200_v63 = vpop.f32.mrf.mxu3 }
 0x911   : > { %v1201_v29 = vadd.f32 %v1711_v8, %v1200_v63  ;;  %v1763_v8 = vld [vmem:[%s2365_s23] ss:$0 sm:$0xff] (%p265_p0) }
 0x913   : > { %v1204_v32 = vadd.f32 %v1201_v29, %v2222_v59 }
 0x915   : > { %v1212_v30 = vsel %vm173_vm5, %v1204_v32, 0.0 }
 0x916   : > { %1213 = vadd.xlane.f32.xlu0 %v1212_v30 }
 0x981   : > { %v1211_v31 = vpop.xlane.xlu2 %1210 }
 0x982   : > { %v1215_v58 = vmul.f32 %v1211_v31, %v1990_v41 }
 0x984   : > { %v1217_v24 = vsub.f32 %v1203_v18, %v1215_v58 }
 0x986   : > { %v1219_v33 = vmul.f32 %v1217_v24, %v1217_v24 }
 0x988   : > { %v1221_v35 = vsel %vm173_vm5, %v1219_v33, 0.0 }
 0x989   : > { %v1214_v36 = vpop.xlane.xlu0 %1213  ;;  %1222 = vadd.xlane.f32.xlu1 %v1221_v35 }
 0x98a   : > { %v1216_v37 = vmul.f32 %v1214_v36, %v1990_v41 }
 0x98c   : > { %v1218_v38 = vsub.f32 %v1204_v32, %v1216_v37 }
 0x98e   : > { %v1220_v40 = vmul.f32 %v1218_v38, %v1218_v38 }
 0x990   : > { %v1224_v22 = vsel %vm173_vm5, %v1220_v40, 0.0 }
 0x991   : > { %1225 = vadd.xlane.f32.xlu2 %v1224_v22 }
 0x9fc   : > { %v1223_v59 = vpop.xlane.xlu1 %1222 }
 0x9fd   : > { %v1227_v26 = vmul.f32 %v1223_v59, %v1990_v41 }
 0x9ff   : > { %v1229_v43 = vadd.f32 1e-05, %v1227_v26 }
 0xa01   : > { %1758 = vrsqrt.f32 %v1229_v43  ;;  %vm1237_vm6 = vweird.f32 %v1229_v43 }
 0xa04   : > { %v1226_v44 = vpop.xlane.xlu2 %1225 }
 0xa05   : > { %v1228_v42 = vmul.f32 %v1226_v44, %v1990_v41  ;;  %v1637_v41 = vld [vmem:[%s2362_s20] sm:$0xff] (%p265_p0) }
 0xa06   :  { %1315 = vmatpush.bf16.msra.mxu0 (%p265_p0), %v1637_v41 }
 0xa07   : > { %v1759_v34 = vpop.eup %1758  ;;  %v1230_v45 = vadd.f32 1e-05, %v1228_v42 }
 0xa08   : > { %v1232_v39 = vmul.f32 %v1759_v34, %v1229_v43  ;;  %vm1238_vm3 = vweird.f32 %v1759_v34 }
 0xa09   : > { %1760 = vrsqrt.f32 %v1230_v45  ;;  %vm1239_vm7 = vmor %vm1237_vm6, %vm1238_vm3  ;;  %vm1247_vm9 = vweird.f32 %v1230_v45 }
 0xa0a   : > { %v1233_v46 = vmul.f32 %v1759_v34, %v1232_v39 }
 0xa0c   : > { %v1234_v47 = vmul.f32 0.5, %v1233_v46 }
 0xa0e   : > { %v1235_v48 = vsub.f32 1.5, %v1234_v47 }
 0xa0f   : > { %v1761_v49 = vpop.eup %1760 }
 0xa10   : > { %v1236_v50 = vmul.f32 %v1759_v34, %v1235_v48  ;;  %v1242_v51 = vmul.f32 %v1761_v49, %v1230_v45  ;;  %vm1248_vm8 = vweird.f32 %v1761_v49 }
 0xa11   : > { %vm1249_vm10 = vmor %vm1247_vm9, %vm1248_vm8 }
 0xa12   : > { %v1240_v53 = vsel %vm1239_vm7, %v1759_v34, %v1236_v50  ;;  %v1243_v54 = vmul.f32 %v1761_v49, %v1242_v51 }
 0xa13   : > { %v1251_v56 = vmul.f32 %v1240_v53, %v1217_v24 }
 0xa14   : > { %v1244_v60 = vmul.f32 0.5, %v1243_v54 }
 0xa15   : > { %v1256_v61 = vmul.f32 %v1712_v52, %v1251_v56 }
 0xa16   : > { %v1245_v62 = vsub.f32 1.5, %v1244_v60 }
 0xa17   : > { %v1261_v1 = vadd.f32 %v1713_v55, %v1256_v61  }
 0xa18   : > { %v1246_v2 = vmul.f32 %v1761_v49, %v1245_v62 }
 0xa19   : > { %v2393_v13 = vmov %v1261_v1 }
 0xa1a   : > { %v1250_v3 = vsel %vm1249_vm10, %v1761_v49, %v1246_v2 }
 0xa1b   : > { %v1252_v4 = vmul.f32 %v1250_v3, %v1218_v38 }
 0xa1d   : > { %v1257_v5 = vmul.f32 %v1712_v52, %v1252_v4  ;;  %267 = sbr.rel (!%p265_p0) target bundleno = 552 (0x228), region = 135 }
 0xa1f   : > { %v1262_v6 = vadd.f32 %v1713_v55, %v1257_v5  }
 0xa21   : > { %v2392_v18 = vmov %v1262_v6  ;;  %v1264_v12 = vrot.slane (%p265_p0), %v1262_v6, 7 }
 0xa23   :  { %v1267_v57 = vsel %vm1266_vm4, %v1261_v1, %v1264_v12 }
 0xa24   :  { %v1277_v14 = vpack.c.bf16 %v1267_v57, %v1267_v57 }
 0xa26   :  { %1585 = vmatmul.msk.bf16.vlgmr.msra.gmra.mxu0 %vm173_vm5, %v1277_v14 }
 0xaa3   :  { %v1317_v0 = vpop.f32.mrf.mxu0 }
 0xaa4   :  { %v1318_v20 = vadd.f32 %v1762_v19, %v1317_v0 }
 0xaa6   :  { %1764 = vtanh.f32 %v1318_v20 }
 0xaab   :  { %v1319_v13 = vpop.f32.mrf.mxu0 }
 0xaac   :  { %v1765_v21 = vpop.eup %1764 }
 0xaad   :  { %v1331_v23 = vpack.c.bf16 %v1765_v21, %v1765_v21 }
 0xaaf   :  { %1602 = vmatmul.msk.bf16.vlgmr.msra.gmra.mxu1 %vm173_vm5, %v1331_v23 }
 0xb2c   :  { %v1371_v25 = vpop.f32.mrf.mxu1 }
 0xb2d   :  { %v1372_v27 = vadd.f32 %v1763_v8, %v1371_v25 }
 0xb2f   :  { %1375 = vst [vmem:[#allocation2] sm:$0x3] %v1372_v27 }
 0xb30   :  { %1386 = dma.vmem_to_hbm [thread:$0]  %s1382_s28, 32, %s1384_s19, [#allocation3]  }
 0xb34   :  { %v1373_v18 = vpop.f32.mrf.mxu1 }
 0xb35   :  { %1802 = dma.done.wait [#allocation3], 32  }
 0xb36   :  { %1803 = vsyncadd [#allocation3], 4294967264 }
 0xb37   :  { %1391 = vsyncpa [#allocation3], 1 }

</bundles_post_ra>
